<compile_context>
chip_gen: v5e
topology: v5e:2x2
jax: 0.10.0
libtpu: 0.0.40
codegen_flags: <defaults>
</compile_context>

<pallas_src>
import functools

import jax
import jax.numpy as jnp
import numpy as np
from jax.experimental import pallas as pl
from jax.experimental.pallas import tpu as pltpu

LAYER_SIZES = (1, 10, 10, 10, 1)
FEAT_PAD = 16  # padded feature width (sublane dim), >= max hidden width 10


def mlp_kernel(x_ref, w_ref, b_ref, o_ref):
    """Whole forward pass for one lane-dense batch tile.

    x_ref: (1, B)        input, batch on lanes
    w_ref: (L, F, F)     packed weights, w[l, j, k] = weight(in k -> out j), zero-padded
    b_ref: (L, F, 1)     packed biases, zero-padded
    o_ref: (1, B)        output, batch on lanes
    """
    B = x_ref.shape[-1]
    L, F, _ = w_ref.shape

    w = w_ref[...].astype(jnp.float32)   # (L, F, F) — tiny, lives in vregs
    b = b_ref[...].astype(jnp.float32)   # (L, F, 1)
    h = x_ref[...].astype(jnp.float32)   # (1, B)

    for l in range(L):
        n_in = h.shape[0]                # 1 for the first layer, F afterwards
        # acc[j, :] = b[l, j] + sum_k w[l, j, k] * h[k, :]
        # Pure VPU FMAs with (F,1)-column broadcast operands; no MXU traffic
        # for these tiny contractions.  Bias rides on the first term.
        acc = w[l, :, 0:1] * h[0:1, :] + b[l]          # (F, B)
        for k in range(1, n_in):
            acc = acc + w[l, :, k:k + 1] * h[k:k + 1, :]
        h = jnp.maximum(acc, 0.0) if l < L - 1 else acc

    # Real output is feature row 0 (layer 4 has out_features = 1).
    o_ref[...] = h[0:1, :].astype(o_ref.dtype)


@functools.partial(jax.jit, static_argnames=("tile_b",))
def mlp_forward(x, wslab, bslab, *, tile_b=2048):
    """x: (N, 1) float32.  wslab: (4,16,16) f32.  bslab: (4,16,1) f32."""
    n, d_in = x.shape
    assert d_in == 1

    # Batch-on-lanes layout: (1, N); pad batch to a multiple of the tile.
    xt = x.reshape(1, n)
    b_pad = ((n + 127) // 128) * 128
    tb = min(tile_b, b_pad)
    b_pad = ((b_pad + tb - 1) // tb) * tb
    if b_pad != n:
        xt = jnp.pad(xt, ((0, 0), (0, b_pad - n)))

    grid = (b_pad // tb,)

    out_t = pl.pallas_call(
        mlp_kernel,
        out_shape=jax.ShapeDtypeStruct((1, b_pad), x.dtype),
        grid_spec=pltpu.PrefetchScalarGridSpec(
            num_scalar_prefetch=0,
            grid=grid,
            in_specs=[
                # lane-dense input tile over the batch
                pl.BlockSpec((1, tb), lambda i: (0, i)),
                # packed params: whole-array blocks, resident across grid steps
                pl.BlockSpec(wslab.shape, lambda i: (0, 0, 0)),
                pl.BlockSpec(bslab.shape, lambda i: (0, 0, 0)),
            ],
            # lane-dense output tile -> unmasked full-vector stores
            out_specs=pl.BlockSpec((1, tb), lambda i: (0, i)),
        ),
        compiler_params=pltpu.CompilerParams(
            dimension_semantics=("parallel",),  # shards across v7x's 2 TCs at large N
        ),
    )(xt, wslab, bslab)

    return out_t[:, :n].reshape(n, 1)


def init_params(key, layer_sizes):
    """nn.Linear-style init: W,b ~ U(-1/sqrt(fan_in), 1/sqrt(fan_in)); W is (out, in)."""
    params = []
    for n_in, n_out in zip(layer_sizes[:-1], layer_sizes[1:]):
        key, kw, kb = jax.random.split(key, 3)
        bound = 1.0 / np.sqrt(n_in)
        w = jax.random.uniform(kw, (n_out, n_in), jnp.float32, -bound, bound)
        b = jax.random.uniform(kb, (n_out,), jnp.float32, -bound, bound)
        params.append((w, b))
    return params


def pack_params(params, feat_pad=FEAT_PAD):
    """Pack PyTorch-convention (out,in) weights + (out,) biases into padded slabs."""
    n_layers = len(params)
    wslab = np.zeros((n_layers, feat_pad, feat_pad), np.float32)
    bslab = np.zeros((n_layers, feat_pad, 1), np.float32)
    for l, (w, b) in enumerate(params):
        n_out, n_in = w.shape
        wslab[l, :n_out, :n_in] = np.asarray(w)
        bslab[l, :n_out, 0] = np.asarray(b).reshape(-1)
    return jnp.asarray(wslab), jnp.asarray(bslab)


def mlp_reference(x, params):
    h = x
    for i, (w, b) in enumerate(params):
        h = h @ w.T + b
        if i < len(params) - 1:
            h = jnp.maximum(h, 0.0)
    return h


if __name__ == "__main__":
    key = jax.random.PRNGKey(0)
    params = init_params(key, LAYER_SIZES)
    wslab, bslab = pack_params(params)

    # Same input as the lecture script: X = linspace(-3, 3, N).reshape(-1, 1) + pi*10
    n = 500
    x = (jnp.linspace(-3.0, 3.0, n, dtype=jnp.float32).reshape(-1, 1)
         + 3.1415926 * 10).astype(jnp.float32)

    out = mlp_forward(x, wslab, bslab, tile_b=2048)
    out = jax.block_until_ready(out)

    ref = mlp_reference(x, params)
    np.testing.assert_allclose(np.asarray(out), np.asarray(ref), rtol=1e-5, atol=1e-4)

    print("KERNEL_OK")
</pallas_src>

<mosaic_0001>
module attributes {stable_mosaic.version = 11 : i64} {
  func.func @mlp_kernel(%arg0: i32, %arg1: memref<1x512xf32, #tpu.memory_space<vmem>>, %arg2: memref<4x16x16xf32, #tpu.memory_space<vmem>>, %arg3: memref<4x16x1xf32, #tpu.memory_space<vmem>>, %arg4: memref<1x512xf32, #tpu.memory_space<vmem>>) attributes {dimension_semantics = [#tpu.dimension_semantics<parallel>], iteration_bounds = array<i64: 1>, scalar_prefetch = 0 : i64, scratch_operands = 0 : i64, tpu.core_type = #tpu.core_type<tc>, window_params = [{transform_indices = @transform_0, window_bounds = array<i64: 1, 512>}, {pipeline_mode = #tpu.pipeline_mode<synchronous>, transform_indices = @transform_1, window_bounds = array<i64: 4, 16, 16>}, {pipeline_mode = #tpu.pipeline_mode<synchronous>, transform_indices = @transform_2, window_bounds = array<i64: 4, 16, 1>}, {transform_indices = @transform_3, window_bounds = array<i64: 1, 512>}]} {
    %c0 = arith.constant 0 : index
    %c0_0 = arith.constant 0 : index
    %c0_1 = arith.constant 0 : index
    %0 = vector.load %arg2[%c0, %c0_0, %c0_1] : memref<4x16x16xf32, #tpu.memory_space<vmem>>, vector<4x16x16xf32>
    %c0_2 = arith.constant 0 : index
    %c0_3 = arith.constant 0 : index
    %c0_4 = arith.constant 0 : index
    %1 = vector.load %arg3[%c0_2, %c0_3, %c0_4] : memref<4x16x1xf32, #tpu.memory_space<vmem>>, vector<4x16x1xf32>
    %c0_5 = arith.constant 0 : index
    %c0_6 = arith.constant 0 : index
    %2 = vector.load %arg1[%c0_5, %c0_6] : memref<1x512xf32, #tpu.memory_space<vmem>>, vector<1x512xf32>
    %3 = vector.extract_strided_slice %0 {offsets = [0, 0, 0], sizes = [1, 16, 1], strides = [1, 1, 1]} : vector<4x16x16xf32> to vector<1x16x1xf32>
    %4 = vector.shape_cast %3 : vector<1x16x1xf32> to vector<16x1xf32>
    %5 = vector.broadcast %4 : vector<16x1xf32> to vector<16x512xf32>
    %6 = vector.broadcast %2 : vector<1x512xf32> to vector<16x512xf32>
    %7 = arith.mulf %5, %6 : vector<16x512xf32>
    %8 = vector.extract_strided_slice %1 {offsets = [0, 0, 0], sizes = [1, 16, 1], strides = [1, 1, 1]} : vector<4x16x1xf32> to vector<1x16x1xf32>
    %9 = vector.shape_cast %8 : vector<1x16x1xf32> to vector<16x1xf32>
    %10 = vector.broadcast %9 : vector<16x1xf32> to vector<16x512xf32>
    %11 = arith.addf %7, %10 : vector<16x512xf32>
    %cst = arith.constant 0.000000e+00 : f32
    %12 = vector.broadcast %cst : f32 to vector<16x512xf32>
    %13 = arith.maximumf %11, %12 : vector<16x512xf32>
    %14 = vector.extract_strided_slice %0 {offsets = [1, 0, 0], sizes = [1, 16, 1], strides = [1, 1, 1]} : vector<4x16x16xf32> to vector<1x16x1xf32>
    %15 = vector.shape_cast %14 : vector<1x16x1xf32> to vector<16x1xf32>
    %16 = vector.extract_strided_slice %13 {offsets = [0, 0], sizes = [1, 512], strides = [1, 1]} : vector<16x512xf32> to vector<1x512xf32>
    %17 = vector.broadcast %15 : vector<16x1xf32> to vector<16x512xf32>
    %18 = vector.broadcast %16 : vector<1x512xf32> to vector<16x512xf32>
    %19 = arith.mulf %17, %18 : vector<16x512xf32>
    %20 = vector.extract_strided_slice %1 {offsets = [1, 0, 0], sizes = [1, 16, 1], strides = [1, 1, 1]} : vector<4x16x1xf32> to vector<1x16x1xf32>
    %21 = vector.shape_cast %20 : vector<1x16x1xf32> to vector<16x1xf32>
    %22 = vector.broadcast %21 : vector<16x1xf32> to vector<16x512xf32>
    %23 = arith.addf %19, %22 : vector<16x512xf32>
    %24 = vector.extract_strided_slice %0 {offsets = [1, 0, 1], sizes = [1, 16, 1], strides = [1, 1, 1]} : vector<4x16x16xf32> to vector<1x16x1xf32>
    %25 = vector.shape_cast %24 : vector<1x16x1xf32> to vector<16x1xf32>
    %26 = vector.extract_strided_slice %13 {offsets = [1, 0], sizes = [1, 512], strides = [1, 1]} : vector<16x512xf32> to vector<1x512xf32>
    %27 = vector.broadcast %25 : vector<16x1xf32> to vector<16x512xf32>
    %28 = vector.broadcast %26 : vector<1x512xf32> to vector<16x512xf32>
    %29 = arith.mulf %27, %28 : vector<16x512xf32>
    %30 = arith.addf %23, %29 : vector<16x512xf32>
    %31 = vector.extract_strided_slice %0 {offsets = [1, 0, 2], sizes = [1, 16, 1], strides = [1, 1, 1]} : vector<4x16x16xf32> to vector<1x16x1xf32>
    %32 = vector.shape_cast %31 : vector<1x16x1xf32> to vector<16x1xf32>
    %33 = vector.extract_strided_slice %13 {offsets = [2, 0], sizes = [1, 512], strides = [1, 1]} : vector<16x512xf32> to vector<1x512xf32>
    %34 = vector.broadcast %32 : vector<16x1xf32> to vector<16x512xf32>
    %35 = vector.broadcast %33 : vector<1x512xf32> to vector<16x512xf32>
    %36 = arith.mulf %34, %35 : vector<16x512xf32>
    %37 = arith.addf %30, %36 : vector<16x512xf32>
    %38 = vector.extract_strided_slice %0 {offsets = [1, 0, 3], sizes = [1, 16, 1], strides = [1, 1, 1]} : vector<4x16x16xf32> to vector<1x16x1xf32>
    %39 = vector.shape_cast %38 : vector<1x16x1xf32> to vector<16x1xf32>
    %40 = vector.extract_strided_slice %13 {offsets = [3, 0], sizes = [1, 512], strides = [1, 1]} : vector<16x512xf32> to vector<1x512xf32>
    %41 = vector.broadcast %39 : vector<16x1xf32> to vector<16x512xf32>
    %42 = vector.broadcast %40 : vector<1x512xf32> to vector<16x512xf32>
    %43 = arith.mulf %41, %42 : vector<16x512xf32>
    %44 = arith.addf %37, %43 : vector<16x512xf32>
    %45 = vector.extract_strided_slice %0 {offsets = [1, 0, 4], sizes = [1, 16, 1], strides = [1, 1, 1]} : vector<4x16x16xf32> to vector<1x16x1xf32>
    %46 = vector.shape_cast %45 : vector<1x16x1xf32> to vector<16x1xf32>
    %47 = vector.extract_strided_slice %13 {offsets = [4, 0], sizes = [1, 512], strides = [1, 1]} : vector<16x512xf32> to vector<1x512xf32>
    %48 = vector.broadcast %46 : vector<16x1xf32> to vector<16x512xf32>
    %49 = vector.broadcast %47 : vector<1x512xf32> to vector<16x512xf32>
    %50 = arith.mulf %48, %49 : vector<16x512xf32>
    %51 = arith.addf %44, %50 : vector<16x512xf32>
    %52 = vector.extract_strided_slice %0 {offsets = [1, 0, 5], sizes = [1, 16, 1], strides = [1, 1, 1]} : vector<4x16x16xf32> to vector<1x16x1xf32>
    %53 = vector.shape_cast %52 : vector<1x16x1xf32> to vector<16x1xf32>
    %54 = vector.extract_strided_slice %13 {offsets = [5, 0], sizes = [1, 512], strides = [1, 1]} : vector<16x512xf32> to vector<1x512xf32>
    %55 = vector.broadcast %53 : vector<16x1xf32> to vector<16x512xf32>
    %56 = vector.broadcast %54 : vector<1x512xf32> to vector<16x512xf32>
    %57 = arith.mulf %55, %56 : vector<16x512xf32>
    %58 = arith.addf %51, %57 : vector<16x512xf32>
    %59 = vector.extract_strided_slice %0 {offsets = [1, 0, 6], sizes = [1, 16, 1], strides = [1, 1, 1]} : vector<4x16x16xf32> to vector<1x16x1xf32>
    %60 = vector.shape_cast %59 : vector<1x16x1xf32> to vector<16x1xf32>
    %61 = vector.extract_strided_slice %13 {offsets = [6, 0], sizes = [1, 512], strides = [1, 1]} : vector<16x512xf32> to vector<1x512xf32>
    %62 = vector.broadcast %60 : vector<16x1xf32> to vector<16x512xf32>
    %63 = vector.broadcast %61 : vector<1x512xf32> to vector<16x512xf32>
    %64 = arith.mulf %62, %63 : vector<16x512xf32>
    %65 = arith.addf %58, %64 : vector<16x512xf32>
    %66 = vector.extract_strided_slice %0 {offsets = [1, 0, 7], sizes = [1, 16, 1], strides = [1, 1, 1]} : vector<4x16x16xf32> to vector<1x16x1xf32>
    %67 = vector.shape_cast %66 : vector<1x16x1xf32> to vector<16x1xf32>
    %68 = vector.extract_strided_slice %13 {offsets = [7, 0], sizes = [1, 512], strides = [1, 1]} : vector<16x512xf32> to vector<1x512xf32>
    %69 = vector.broadcast %67 : vector<16x1xf32> to vector<16x512xf32>
    %70 = vector.broadcast %68 : vector<1x512xf32> to vector<16x512xf32>
    %71 = arith.mulf %69, %70 : vector<16x512xf32>
    %72 = arith.addf %65, %71 : vector<16x512xf32>
    %73 = vector.extract_strided_slice %0 {offsets = [1, 0, 8], sizes = [1, 16, 1], strides = [1, 1, 1]} : vector<4x16x16xf32> to vector<1x16x1xf32>
    %74 = vector.shape_cast %73 : vector<1x16x1xf32> to vector<16x1xf32>
    %75 = vector.extract_strided_slice %13 {offsets = [8, 0], sizes = [1, 512], strides = [1, 1]} : vector<16x512xf32> to vector<1x512xf32>
    %76 = vector.broadcast %74 : vector<16x1xf32> to vector<16x512xf32>
    %77 = vector.broadcast %75 : vector<1x512xf32> to vector<16x512xf32>
    %78 = arith.mulf %76, %77 : vector<16x512xf32>
    %79 = arith.addf %72, %78 : vector<16x512xf32>
    %80 = vector.extract_strided_slice %0 {offsets = [1, 0, 9], sizes = [1, 16, 1], strides = [1, 1, 1]} : vector<4x16x16xf32> to vector<1x16x1xf32>
    %81 = vector.shape_cast %80 : vector<1x16x1xf32> to vector<16x1xf32>
    %82 = vector.extract_strided_slice %13 {offsets = [9, 0], sizes = [1, 512], strides = [1, 1]} : vector<16x512xf32> to vector<1x512xf32>
    %83 = vector.broadcast %81 : vector<16x1xf32> to vector<16x512xf32>
    %84 = vector.broadcast %82 : vector<1x512xf32> to vector<16x512xf32>
    %85 = arith.mulf %83, %84 : vector<16x512xf32>
    %86 = arith.addf %79, %85 : vector<16x512xf32>
    %87 = vector.extract_strided_slice %0 {offsets = [1, 0, 10], sizes = [1, 16, 1], strides = [1, 1, 1]} : vector<4x16x16xf32> to vector<1x16x1xf32>
    %88 = vector.shape_cast %87 : vector<1x16x1xf32> to vector<16x1xf32>
    %89 = vector.extract_strided_slice %13 {offsets = [10, 0], sizes = [1, 512], strides = [1, 1]} : vector<16x512xf32> to vector<1x512xf32>
    %90 = vector.broadcast %88 : vector<16x1xf32> to vector<16x512xf32>
    %91 = vector.broadcast %89 : vector<1x512xf32> to vector<16x512xf32>
    %92 = arith.mulf %90, %91 : vector<16x512xf32>
    %93 = arith.addf %86, %92 : vector<16x512xf32>
    %94 = vector.extract_strided_slice %0 {offsets = [1, 0, 11], sizes = [1, 16, 1], strides = [1, 1, 1]} : vector<4x16x16xf32> to vector<1x16x1xf32>
    %95 = vector.shape_cast %94 : vector<1x16x1xf32> to vector<16x1xf32>
    %96 = vector.extract_strided_slice %13 {offsets = [11, 0], sizes = [1, 512], strides = [1, 1]} : vector<16x512xf32> to vector<1x512xf32>
    %97 = vector.broadcast %95 : vector<16x1xf32> to vector<16x512xf32>
    %98 = vector.broadcast %96 : vector<1x512xf32> to vector<16x512xf32>
    %99 = arith.mulf %97, %98 : vector<16x512xf32>
    %100 = arith.addf %93, %99 : vector<16x512xf32>
    %101 = vector.extract_strided_slice %0 {offsets = [1, 0, 12], sizes = [1, 16, 1], strides = [1, 1, 1]} : vector<4x16x16xf32> to vector<1x16x1xf32>
    %102 = vector.shape_cast %101 : vector<1x16x1xf32> to vector<16x1xf32>
    %103 = vector.extract_strided_slice %13 {offsets = [12, 0], sizes = [1, 512], strides = [1, 1]} : vector<16x512xf32> to vector<1x512xf32>
    %104 = vector.broadcast %102 : vector<16x1xf32> to vector<16x512xf32>
    %105 = vector.broadcast %103 : vector<1x512xf32> to vector<16x512xf32>
    %106 = arith.mulf %104, %105 : vector<16x512xf32>
    %107 = arith.addf %100, %106 : vector<16x512xf32>
    %108 = vector.extract_strided_slice %0 {offsets = [1, 0, 13], sizes = [1, 16, 1], strides = [1, 1, 1]} : vector<4x16x16xf32> to vector<1x16x1xf32>
    %109 = vector.shape_cast %108 : vector<1x16x1xf32> to vector<16x1xf32>
    %110 = vector.extract_strided_slice %13 {offsets = [13, 0], sizes = [1, 512], strides = [1, 1]} : vector<16x512xf32> to vector<1x512xf32>
    %111 = vector.broadcast %109 : vector<16x1xf32> to vector<16x512xf32>
    %112 = vector.broadcast %110 : vector<1x512xf32> to vector<16x512xf32>
    %113 = arith.mulf %111, %112 : vector<16x512xf32>
    %114 = arith.addf %107, %113 : vector<16x512xf32>
    %115 = vector.extract_strided_slice %0 {offsets = [1, 0, 14], sizes = [1, 16, 1], strides = [1, 1, 1]} : vector<4x16x16xf32> to vector<1x16x1xf32>
    %116 = vector.shape_cast %115 : vector<1x16x1xf32> to vector<16x1xf32>
    %117 = vector.extract_strided_slice %13 {offsets = [14, 0], sizes = [1, 512], strides = [1, 1]} : vector<16x512xf32> to vector<1x512xf32>
    %118 = vector.broadcast %116 : vector<16x1xf32> to vector<16x512xf32>
    %119 = vector.broadcast %117 : vector<1x512xf32> to vector<16x512xf32>
    %120 = arith.mulf %118, %119 : vector<16x512xf32>
    %121 = arith.addf %114, %120 : vector<16x512xf32>
    %122 = vector.extract_strided_slice %0 {offsets = [1, 0, 15], sizes = [1, 16, 1], strides = [1, 1, 1]} : vector<4x16x16xf32> to vector<1x16x1xf32>
    %123 = vector.shape_cast %122 : vector<1x16x1xf32> to vector<16x1xf32>
    %124 = vector.extract_strided_slice %13 {offsets = [15, 0], sizes = [1, 512], strides = [1, 1]} : vector<16x512xf32> to vector<1x512xf32>
    %125 = vector.broadcast %123 : vector<16x1xf32> to vector<16x512xf32>
    %126 = vector.broadcast %124 : vector<1x512xf32> to vector<16x512xf32>
    %127 = arith.mulf %125, %126 : vector<16x512xf32>
    %128 = arith.addf %121, %127 : vector<16x512xf32>
    %cst_7 = arith.constant 0.000000e+00 : f32
    %129 = vector.broadcast %cst_7 : f32 to vector<16x512xf32>
    %130 = arith.maximumf %128, %129 : vector<16x512xf32>
    %131 = vector.extract_strided_slice %0 {offsets = [2, 0, 0], sizes = [1, 16, 1], strides = [1, 1, 1]} : vector<4x16x16xf32> to vector<1x16x1xf32>
    %132 = vector.shape_cast %131 : vector<1x16x1xf32> to vector<16x1xf32>
    %133 = vector.extract_strided_slice %130 {offsets = [0, 0], sizes = [1, 512], strides = [1, 1]} : vector<16x512xf32> to vector<1x512xf32>
    %134 = vector.broadcast %132 : vector<16x1xf32> to vector<16x512xf32>
    %135 = vector.broadcast %133 : vector<1x512xf32> to vector<16x512xf32>
    %136 = arith.mulf %134, %135 : vector<16x512xf32>
    %137 = vector.extract_strided_slice %1 {offsets = [2, 0, 0], sizes = [1, 16, 1], strides = [1, 1, 1]} : vector<4x16x1xf32> to vector<1x16x1xf32>
    %138 = vector.shape_cast %137 : vector<1x16x1xf32> to vector<16x1xf32>
    %139 = vector.broadcast %138 : vector<16x1xf32> to vector<16x512xf32>
    %140 = arith.addf %136, %139 : vector<16x512xf32>
    %141 = vector.extract_strided_slice %0 {offsets = [2, 0, 1], sizes = [1, 16, 1], strides = [1, 1, 1]} : vector<4x16x16xf32> to vector<1x16x1xf32>
    %142 = vector.shape_cast %141 : vector<1x16x1xf32> to vector<16x1xf32>
    %143 = vector.extract_strided_slice %130 {offsets = [1, 0], sizes = [1, 512], strides = [1, 1]} : vector<16x512xf32> to vector<1x512xf32>
    %144 = vector.broadcast %142 : vector<16x1xf32> to vector<16x512xf32>
    %145 = vector.broadcast %143 : vector<1x512xf32> to vector<16x512xf32>
    %146 = arith.mulf %144, %145 : vector<16x512xf32>
    %147 = arith.addf %140, %146 : vector<16x512xf32>
    %148 = vector.extract_strided_slice %0 {offsets = [2, 0, 2], sizes = [1, 16, 1], strides = [1, 1, 1]} : vector<4x16x16xf32> to vector<1x16x1xf32>
    %149 = vector.shape_cast %148 : vector<1x16x1xf32> to vector<16x1xf32>
    %150 = vector.extract_strided_slice %130 {offsets = [2, 0], sizes = [1, 512], strides = [1, 1]} : vector<16x512xf32> to vector<1x512xf32>
    %151 = vector.broadcast %149 : vector<16x1xf32> to vector<16x512xf32>
    %152 = vector.broadcast %150 : vector<1x512xf32> to vector<16x512xf32>
    %153 = arith.mulf %151, %152 : vector<16x512xf32>
    %154 = arith.addf %147, %153 : vector<16x512xf32>
    %155 = vector.extract_strided_slice %0 {offsets = [2, 0, 3], sizes = [1, 16, 1], strides = [1, 1, 1]} : vector<4x16x16xf32> to vector<1x16x1xf32>
    %156 = vector.shape_cast %155 : vector<1x16x1xf32> to vector<16x1xf32>
    %157 = vector.extract_strided_slice %130 {offsets = [3, 0], sizes = [1, 512], strides = [1, 1]} : vector<16x512xf32> to vector<1x512xf32>
    %158 = vector.broadcast %156 : vector<16x1xf32> to vector<16x512xf32>
    %159 = vector.broadcast %157 : vector<1x512xf32> to vector<16x512xf32>
    %160 = arith.mulf %158, %159 : vector<16x512xf32>
    %161 = arith.addf %154, %160 : vector<16x512xf32>
    %162 = vector.extract_strided_slice %0 {offsets = [2, 0, 4], sizes = [1, 16, 1], strides = [1, 1, 1]} : vector<4x16x16xf32> to vector<1x16x1xf32>
    %163 = vector.shape_cast %162 : vector<1x16x1xf32> to vector<16x1xf32>
    %164 = vector.extract_strided_slice %130 {offsets = [4, 0], sizes = [1, 512], strides = [1, 1]} : vector<16x512xf32> to vector<1x512xf32>
    %165 = vector.broadcast %163 : vector<16x1xf32> to vector<16x512xf32>
    %166 = vector.broadcast %164 : vector<1x512xf32> to vector<16x512xf32>
    %167 = arith.mulf %165, %166 : vector<16x512xf32>
    %168 = arith.addf %161, %167 : vector<16x512xf32>
    %169 = vector.extract_strided_slice %0 {offsets = [2, 0, 5], sizes = [1, 16, 1], strides = [1, 1, 1]} : vector<4x16x16xf32> to vector<1x16x1xf32>
    %170 = vector.shape_cast %169 : vector<1x16x1xf32> to vector<16x1xf32>
    %171 = vector.extract_strided_slice %130 {offsets = [5, 0], sizes = [1, 512], strides = [1, 1]} : vector<16x512xf32> to vector<1x512xf32>
    %172 = vector.broadcast %170 : vector<16x1xf32> to vector<16x512xf32>
    %173 = vector.broadcast %171 : vector<1x512xf32> to vector<16x512xf32>
    %174 = arith.mulf %172, %173 : vector<16x512xf32>
    %175 = arith.addf %168, %174 : vector<16x512xf32>
    %176 = vector.extract_strided_slice %0 {offsets = [2, 0, 6], sizes = [1, 16, 1], strides = [1, 1, 1]} : vector<4x16x16xf32> to vector<1x16x1xf32>
    %177 = vector.shape_cast %176 : vector<1x16x1xf32> to vector<16x1xf32>
    %178 = vector.extract_strided_slice %130 {offsets = [6, 0], sizes = [1, 512], strides = [1, 1]} : vector<16x512xf32> to vector<1x512xf32>
    %179 = vector.broadcast %177 : vector<16x1xf32> to vector<16x512xf32>
    %180 = vector.broadcast %178 : vector<1x512xf32> to vector<16x512xf32>
    %181 = arith.mulf %179, %180 : vector<16x512xf32>
    %182 = arith.addf %175, %181 : vector<16x512xf32>
    %183 = vector.extract_strided_slice %0 {offsets = [2, 0, 7], sizes = [1, 16, 1], strides = [1, 1, 1]} : vector<4x16x16xf32> to vector<1x16x1xf32>
    %184 = vector.shape_cast %183 : vector<1x16x1xf32> to vector<16x1xf32>
    %185 = vector.extract_strided_slice %130 {offsets = [7, 0], sizes = [1, 512], strides = [1, 1]} : vector<16x512xf32> to vector<1x512xf32>
    %186 = vector.broadcast %184 : vector<16x1xf32> to vector<16x512xf32>
    %187 = vector.broadcast %185 : vector<1x512xf32> to vector<16x512xf32>
    %188 = arith.mulf %186, %187 : vector<16x512xf32>
    %189 = arith.addf %182, %188 : vector<16x512xf32>
    %190 = vector.extract_strided_slice %0 {offsets = [2, 0, 8], sizes = [1, 16, 1], strides = [1, 1, 1]} : vector<4x16x16xf32> to vector<1x16x1xf32>
    %191 = vector.shape_cast %190 : vector<1x16x1xf32> to vector<16x1xf32>
    %192 = vector.extract_strided_slice %130 {offsets = [8, 0], sizes = [1, 512], strides = [1, 1]} : vector<16x512xf32> to vector<1x512xf32>
    %193 = vector.broadcast %191 : vector<16x1xf32> to vector<16x512xf32>
    %194 = vector.broadcast %192 : vector<1x512xf32> to vector<16x512xf32>
    %195 = arith.mulf %193, %194 : vector<16x512xf32>
    %196 = arith.addf %189, %195 : vector<16x512xf32>
    %197 = vector.extract_strided_slice %0 {offsets = [2, 0, 9], sizes = [1, 16, 1], strides = [1, 1, 1]} : vector<4x16x16xf32> to vector<1x16x1xf32>
    %198 = vector.shape_cast %197 : vector<1x16x1xf32> to vector<16x1xf32>
    %199 = vector.extract_strided_slice %130 {offsets = [9, 0], sizes = [1, 512], strides = [1, 1]} : vector<16x512xf32> to vector<1x512xf32>
    %200 = vector.broadcast %198 : vector<16x1xf32> to vector<16x512xf32>
    %201 = vector.broadcast %199 : vector<1x512xf32> to vector<16x512xf32>
    %202 = arith.mulf %200, %201 : vector<16x512xf32>
    %203 = arith.addf %196, %202 : vector<16x512xf32>
    %204 = vector.extract_strided_slice %0 {offsets = [2, 0, 10], sizes = [1, 16, 1], strides = [1, 1, 1]} : vector<4x16x16xf32> to vector<1x16x1xf32>
    %205 = vector.shape_cast %204 : vector<1x16x1xf32> to vector<16x1xf32>
    %206 = vector.extract_strided_slice %130 {offsets = [10, 0], sizes = [1, 512], strides = [1, 1]} : vector<16x512xf32> to vector<1x512xf32>
    %207 = vector.broadcast %205 : vector<16x1xf32> to vector<16x512xf32>
    %208 = vector.broadcast %206 : vector<1x512xf32> to vector<16x512xf32>
    %209 = arith.mulf %207, %208 : vector<16x512xf32>
    %210 = arith.addf %203, %209 : vector<16x512xf32>
    %211 = vector.extract_strided_slice %0 {offsets = [2, 0, 11], sizes = [1, 16, 1], strides = [1, 1, 1]} : vector<4x16x16xf32> to vector<1x16x1xf32>
    %212 = vector.shape_cast %211 : vector<1x16x1xf32> to vector<16x1xf32>
    %213 = vector.extract_strided_slice %130 {offsets = [11, 0], sizes = [1, 512], strides = [1, 1]} : vector<16x512xf32> to vector<1x512xf32>
    %214 = vector.broadcast %212 : vector<16x1xf32> to vector<16x512xf32>
    %215 = vector.broadcast %213 : vector<1x512xf32> to vector<16x512xf32>
    %216 = arith.mulf %214, %215 : vector<16x512xf32>
    %217 = arith.addf %210, %216 : vector<16x512xf32>
    %218 = vector.extract_strided_slice %0 {offsets = [2, 0, 12], sizes = [1, 16, 1], strides = [1, 1, 1]} : vector<4x16x16xf32> to vector<1x16x1xf32>
    %219 = vector.shape_cast %218 : vector<1x16x1xf32> to vector<16x1xf32>
    %220 = vector.extract_strided_slice %130 {offsets = [12, 0], sizes = [1, 512], strides = [1, 1]} : vector<16x512xf32> to vector<1x512xf32>
    %221 = vector.broadcast %219 : vector<16x1xf32> to vector<16x512xf32>
    %222 = vector.broadcast %220 : vector<1x512xf32> to vector<16x512xf32>
    %223 = arith.mulf %221, %222 : vector<16x512xf32>
    %224 = arith.addf %217, %223 : vector<16x512xf32>
    %225 = vector.extract_strided_slice %0 {offsets = [2, 0, 13], sizes = [1, 16, 1], strides = [1, 1, 1]} : vector<4x16x16xf32> to vector<1x16x1xf32>
    %226 = vector.shape_cast %225 : vector<1x16x1xf32> to vector<16x1xf32>
    %227 = vector.extract_strided_slice %130 {offsets = [13, 0], sizes = [1, 512], strides = [1, 1]} : vector<16x512xf32> to vector<1x512xf32>
    %228 = vector.broadcast %226 : vector<16x1xf32> to vector<16x512xf32>
    %229 = vector.broadcast %227 : vector<1x512xf32> to vector<16x512xf32>
    %230 = arith.mulf %228, %229 : vector<16x512xf32>
    %231 = arith.addf %224, %230 : vector<16x512xf32>
    %232 = vector.extract_strided_slice %0 {offsets = [2, 0, 14], sizes = [1, 16, 1], strides = [1, 1, 1]} : vector<4x16x16xf32> to vector<1x16x1xf32>
    %233 = vector.shape_cast %232 : vector<1x16x1xf32> to vector<16x1xf32>
    %234 = vector.extract_strided_slice %130 {offsets = [14, 0], sizes = [1, 512], strides = [1, 1]} : vector<16x512xf32> to vector<1x512xf32>
    %235 = vector.broadcast %233 : vector<16x1xf32> to vector<16x512xf32>
    %236 = vector.broadcast %234 : vector<1x512xf32> to vector<16x512xf32>
    %237 = arith.mulf %235, %236 : vector<16x512xf32>
    %238 = arith.addf %231, %237 : vector<16x512xf32>
    %239 = vector.extract_strided_slice %0 {offsets = [2, 0, 15], sizes = [1, 16, 1], strides = [1, 1, 1]} : vector<4x16x16xf32> to vector<1x16x1xf32>
    %240 = vector.shape_cast %239 : vector<1x16x1xf32> to vector<16x1xf32>
    %241 = vector.extract_strided_slice %130 {offsets = [15, 0], sizes = [1, 512], strides = [1, 1]} : vector<16x512xf32> to vector<1x512xf32>
    %242 = vector.broadcast %240 : vector<16x1xf32> to vector<16x512xf32>
    %243 = vector.broadcast %241 : vector<1x512xf32> to vector<16x512xf32>
    %244 = arith.mulf %242, %243 : vector<16x512xf32>
    %245 = arith.addf %238, %244 : vector<16x512xf32>
    %cst_8 = arith.constant 0.000000e+00 : f32
    %246 = vector.broadcast %cst_8 : f32 to vector<16x512xf32>
    %247 = arith.maximumf %245, %246 : vector<16x512xf32>
    %248 = vector.extract_strided_slice %0 {offsets = [3, 0, 0], sizes = [1, 16, 1], strides = [1, 1, 1]} : vector<4x16x16xf32> to vector<1x16x1xf32>
    %249 = vector.shape_cast %248 : vector<1x16x1xf32> to vector<16x1xf32>
    %250 = vector.extract_strided_slice %247 {offsets = [0, 0], sizes = [1, 512], strides = [1, 1]} : vector<16x512xf32> to vector<1x512xf32>
    %251 = vector.broadcast %249 : vector<16x1xf32> to vector<16x512xf32>
    %252 = vector.broadcast %250 : vector<1x512xf32> to vector<16x512xf32>
    %253 = arith.mulf %251, %252 : vector<16x512xf32>
    %254 = vector.extract_strided_slice %1 {offsets = [3, 0, 0], sizes = [1, 16, 1], strides = [1, 1, 1]} : vector<4x16x1xf32> to vector<1x16x1xf32>
    %255 = vector.shape_cast %254 : vector<1x16x1xf32> to vector<16x1xf32>
    %256 = vector.broadcast %255 : vector<16x1xf32> to vector<16x512xf32>
    %257 = arith.addf %253, %256 : vector<16x512xf32>
    %258 = vector.extract_strided_slice %0 {offsets = [3, 0, 1], sizes = [1, 16, 1], strides = [1, 1, 1]} : vector<4x16x16xf32> to vector<1x16x1xf32>
    %259 = vector.shape_cast %258 : vector<1x16x1xf32> to vector<16x1xf32>
    %260 = vector.extract_strided_slice %247 {offsets = [1, 0], sizes = [1, 512], strides = [1, 1]} : vector<16x512xf32> to vector<1x512xf32>
    %261 = vector.broadcast %259 : vector<16x1xf32> to vector<16x512xf32>
    %262 = vector.broadcast %260 : vector<1x512xf32> to vector<16x512xf32>
    %263 = arith.mulf %261, %262 : vector<16x512xf32>
    %264 = arith.addf %257, %263 : vector<16x512xf32>
    %265 = vector.extract_strided_slice %0 {offsets = [3, 0, 2], sizes = [1, 16, 1], strides = [1, 1, 1]} : vector<4x16x16xf32> to vector<1x16x1xf32>
    %266 = vector.shape_cast %265 : vector<1x16x1xf32> to vector<16x1xf32>
    %267 = vector.extract_strided_slice %247 {offsets = [2, 0], sizes = [1, 512], strides = [1, 1]} : vector<16x512xf32> to vector<1x512xf32>
    %268 = vector.broadcast %266 : vector<16x1xf32> to vector<16x512xf32>
    %269 = vector.broadcast %267 : vector<1x512xf32> to vector<16x512xf32>
    %270 = arith.mulf %268, %269 : vector<16x512xf32>
    %271 = arith.addf %264, %270 : vector<16x512xf32>
    %272 = vector.extract_strided_slice %0 {offsets = [3, 0, 3], sizes = [1, 16, 1], strides = [1, 1, 1]} : vector<4x16x16xf32> to vector<1x16x1xf32>
    %273 = vector.shape_cast %272 : vector<1x16x1xf32> to vector<16x1xf32>
    %274 = vector.extract_strided_slice %247 {offsets = [3, 0], sizes = [1, 512], strides = [1, 1]} : vector<16x512xf32> to vector<1x512xf32>
    %275 = vector.broadcast %273 : vector<16x1xf32> to vector<16x512xf32>
    %276 = vector.broadcast %274 : vector<1x512xf32> to vector<16x512xf32>
    %277 = arith.mulf %275, %276 : vector<16x512xf32>
    %278 = arith.addf %271, %277 : vector<16x512xf32>
    %279 = vector.extract_strided_slice %0 {offsets = [3, 0, 4], sizes = [1, 16, 1], strides = [1, 1, 1]} : vector<4x16x16xf32> to vector<1x16x1xf32>
    %280 = vector.shape_cast %279 : vector<1x16x1xf32> to vector<16x1xf32>
    %281 = vector.extract_strided_slice %247 {offsets = [4, 0], sizes = [1, 512], strides = [1, 1]} : vector<16x512xf32> to vector<1x512xf32>
    %282 = vector.broadcast %280 : vector<16x1xf32> to vector<16x512xf32>
    %283 = vector.broadcast %281 : vector<1x512xf32> to vector<16x512xf32>
    %284 = arith.mulf %282, %283 : vector<16x512xf32>
    %285 = arith.addf %278, %284 : vector<16x512xf32>
    %286 = vector.extract_strided_slice %0 {offsets = [3, 0, 5], sizes = [1, 16, 1], strides = [1, 1, 1]} : vector<4x16x16xf32> to vector<1x16x1xf32>
    %287 = vector.shape_cast %286 : vector<1x16x1xf32> to vector<16x1xf32>
    %288 = vector.extract_strided_slice %247 {offsets = [5, 0], sizes = [1, 512], strides = [1, 1]} : vector<16x512xf32> to vector<1x512xf32>
    %289 = vector.broadcast %287 : vector<16x1xf32> to vector<16x512xf32>
    %290 = vector.broadcast %288 : vector<1x512xf32> to vector<16x512xf32>
    %291 = arith.mulf %289, %290 : vector<16x512xf32>
    %292 = arith.addf %285, %291 : vector<16x512xf32>
    %293 = vector.extract_strided_slice %0 {offsets = [3, 0, 6], sizes = [1, 16, 1], strides = [1, 1, 1]} : vector<4x16x16xf32> to vector<1x16x1xf32>
    %294 = vector.shape_cast %293 : vector<1x16x1xf32> to vector<16x1xf32>
    %295 = vector.extract_strided_slice %247 {offsets = [6, 0], sizes = [1, 512], strides = [1, 1]} : vector<16x512xf32> to vector<1x512xf32>
    %296 = vector.broadcast %294 : vector<16x1xf32> to vector<16x512xf32>
    %297 = vector.broadcast %295 : vector<1x512xf32> to vector<16x512xf32>
    %298 = arith.mulf %296, %297 : vector<16x512xf32>
    %299 = arith.addf %292, %298 : vector<16x512xf32>
    %300 = vector.extract_strided_slice %0 {offsets = [3, 0, 7], sizes = [1, 16, 1], strides = [1, 1, 1]} : vector<4x16x16xf32> to vector<1x16x1xf32>
    %301 = vector.shape_cast %300 : vector<1x16x1xf32> to vector<16x1xf32>
    %302 = vector.extract_strided_slice %247 {offsets = [7, 0], sizes = [1, 512], strides = [1, 1]} : vector<16x512xf32> to vector<1x512xf32>
    %303 = vector.broadcast %301 : vector<16x1xf32> to vector<16x512xf32>
    %304 = vector.broadcast %302 : vector<1x512xf32> to vector<16x512xf32>
    %305 = arith.mulf %303, %304 : vector<16x512xf32>
    %306 = arith.addf %299, %305 : vector<16x512xf32>
    %307 = vector.extract_strided_slice %0 {offsets = [3, 0, 8], sizes = [1, 16, 1], strides = [1, 1, 1]} : vector<4x16x16xf32> to vector<1x16x1xf32>
    %308 = vector.shape_cast %307 : vector<1x16x1xf32> to vector<16x1xf32>
    %309 = vector.extract_strided_slice %247 {offsets = [8, 0], sizes = [1, 512], strides = [1, 1]} : vector<16x512xf32> to vector<1x512xf32>
    %310 = vector.broadcast %308 : vector<16x1xf32> to vector<16x512xf32>
    %311 = vector.broadcast %309 : vector<1x512xf32> to vector<16x512xf32>
    %312 = arith.mulf %310, %311 : vector<16x512xf32>
    %313 = arith.addf %306, %312 : vector<16x512xf32>
    %314 = vector.extract_strided_slice %0 {offsets = [3, 0, 9], sizes = [1, 16, 1], strides = [1, 1, 1]} : vector<4x16x16xf32> to vector<1x16x1xf32>
    %315 = vector.shape_cast %314 : vector<1x16x1xf32> to vector<16x1xf32>
    %316 = vector.extract_strided_slice %247 {offsets = [9, 0], sizes = [1, 512], strides = [1, 1]} : vector<16x512xf32> to vector<1x512xf32>
    %317 = vector.broadcast %315 : vector<16x1xf32> to vector<16x512xf32>
    %318 = vector.broadcast %316 : vector<1x512xf32> to vector<16x512xf32>
    %319 = arith.mulf %317, %318 : vector<16x512xf32>
    %320 = arith.addf %313, %319 : vector<16x512xf32>
    %321 = vector.extract_strided_slice %0 {offsets = [3, 0, 10], sizes = [1, 16, 1], strides = [1, 1, 1]} : vector<4x16x16xf32> to vector<1x16x1xf32>
    %322 = vector.shape_cast %321 : vector<1x16x1xf32> to vector<16x1xf32>
    %323 = vector.extract_strided_slice %247 {offsets = [10, 0], sizes = [1, 512], strides = [1, 1]} : vector<16x512xf32> to vector<1x512xf32>
    %324 = vector.broadcast %322 : vector<16x1xf32> to vector<16x512xf32>
    %325 = vector.broadcast %323 : vector<1x512xf32> to vector<16x512xf32>
    %326 = arith.mulf %324, %325 : vector<16x512xf32>
    %327 = arith.addf %320, %326 : vector<16x512xf32>
    %328 = vector.extract_strided_slice %0 {offsets = [3, 0, 11], sizes = [1, 16, 1], strides = [1, 1, 1]} : vector<4x16x16xf32> to vector<1x16x1xf32>
    %329 = vector.shape_cast %328 : vector<1x16x1xf32> to vector<16x1xf32>
    %330 = vector.extract_strided_slice %247 {offsets = [11, 0], sizes = [1, 512], strides = [1, 1]} : vector<16x512xf32> to vector<1x512xf32>
    %331 = vector.broadcast %329 : vector<16x1xf32> to vector<16x512xf32>
    %332 = vector.broadcast %330 : vector<1x512xf32> to vector<16x512xf32>
    %333 = arith.mulf %331, %332 : vector<16x512xf32>
    %334 = arith.addf %327, %333 : vector<16x512xf32>
    %335 = vector.extract_strided_slice %0 {offsets = [3, 0, 12], sizes = [1, 16, 1], strides = [1, 1, 1]} : vector<4x16x16xf32> to vector<1x16x1xf32>
    %336 = vector.shape_cast %335 : vector<1x16x1xf32> to vector<16x1xf32>
    %337 = vector.extract_strided_slice %247 {offsets = [12, 0], sizes = [1, 512], strides = [1, 1]} : vector<16x512xf32> to vector<1x512xf32>
    %338 = vector.broadcast %336 : vector<16x1xf32> to vector<16x512xf32>
    %339 = vector.broadcast %337 : vector<1x512xf32> to vector<16x512xf32>
    %340 = arith.mulf %338, %339 : vector<16x512xf32>
    %341 = arith.addf %334, %340 : vector<16x512xf32>
    %342 = vector.extract_strided_slice %0 {offsets = [3, 0, 13], sizes = [1, 16, 1], strides = [1, 1, 1]} : vector<4x16x16xf32> to vector<1x16x1xf32>
    %343 = vector.shape_cast %342 : vector<1x16x1xf32> to vector<16x1xf32>
    %344 = vector.extract_strided_slice %247 {offsets = [13, 0], sizes = [1, 512], strides = [1, 1]} : vector<16x512xf32> to vector<1x512xf32>
    %345 = vector.broadcast %343 : vector<16x1xf32> to vector<16x512xf32>
    %346 = vector.broadcast %344 : vector<1x512xf32> to vector<16x512xf32>
    %347 = arith.mulf %345, %346 : vector<16x512xf32>
    %348 = arith.addf %341, %347 : vector<16x512xf32>
    %349 = vector.extract_strided_slice %0 {offsets = [3, 0, 14], sizes = [1, 16, 1], strides = [1, 1, 1]} : vector<4x16x16xf32> to vector<1x16x1xf32>
    %350 = vector.shape_cast %349 : vector<1x16x1xf32> to vector<16x1xf32>
    %351 = vector.extract_strided_slice %247 {offsets = [14, 0], sizes = [1, 512], strides = [1, 1]} : vector<16x512xf32> to vector<1x512xf32>
    %352 = vector.broadcast %350 : vector<16x1xf32> to vector<16x512xf32>
    %353 = vector.broadcast %351 : vector<1x512xf32> to vector<16x512xf32>
    %354 = arith.mulf %352, %353 : vector<16x512xf32>
    %355 = arith.addf %348, %354 : vector<16x512xf32>
    %356 = vector.extract_strided_slice %0 {offsets = [3, 0, 15], sizes = [1, 16, 1], strides = [1, 1, 1]} : vector<4x16x16xf32> to vector<1x16x1xf32>
    %357 = vector.shape_cast %356 : vector<1x16x1xf32> to vector<16x1xf32>
    %358 = vector.extract_strided_slice %247 {offsets = [15, 0], sizes = [1, 512], strides = [1, 1]} : vector<16x512xf32> to vector<1x512xf32>
    %359 = vector.broadcast %357 : vector<16x1xf32> to vector<16x512xf32>
    %360 = vector.broadcast %358 : vector<1x512xf32> to vector<16x512xf32>
    %361 = arith.mulf %359, %360 : vector<16x512xf32>
    %362 = arith.addf %355, %361 : vector<16x512xf32>
    %363 = vector.extract_strided_slice %362 {offsets = [0, 0], sizes = [1, 512], strides = [1, 1]} : vector<16x512xf32> to vector<1x512xf32>
    %c0_9 = arith.constant 0 : index
    %c0_10 = arith.constant 0 : index
    %364 = vector.load %arg4[%c0_9, %c0_10] : memref<1x512xf32, #tpu.memory_space<vmem>>, vector<1x512xf32>
    tpu.vector_store %arg4[%c0_9, %c0_10], %363 {strides = array<i32>} : memref<1x512xf32, #tpu.memory_space<vmem>>, vector<1x512xf32>,
    return
  }
  func.func @transform_0(%arg0: i32) -> (i32, i32) {
    %c0_i32 = arith.constant 0 : i32
    %c0_i32_0 = arith.constant 0 : i32
    return %c0_i32, %arg0 : i32, i32
  }
  func.func @transform_1(%arg0: i32) -> (i32, i32, i32) {
    %c0_i32 = arith.constant 0 : i32
    %c0_i32_0 = arith.constant 0 : i32
    %c0_i32_1 = arith.constant 0 : i32
    %c0_i32_2 = arith.constant 0 : i32
    return %c0_i32, %c0_i32_0, %c0_i32_1 : i32, i32, i32
  }
  func.func @transform_2(%arg0: i32) -> (i32, i32, i32) {
    %c0_i32 = arith.constant 0 : i32
    %c0_i32_0 = arith.constant 0 : i32
    %c0_i32_1 = arith.constant 0 : i32
    %c0_i32_2 = arith.constant 0 : i32
    return %c0_i32, %c0_i32_0, %c0_i32_1 : i32, i32, i32
  }
  func.func @transform_3(%arg0: i32) -> (i32, i32) {
    %c0_i32 = arith.constant 0 : i32
    %c0_i32_0 = arith.constant 0 : i32
    return %c0_i32, %arg0 : i32, i32
  }
}

</mosaic_0001>

<bundles_post_ra>
// kernel: mlp_forward.1
= control target key start
LH: loop header
LB: loop body
LE: loop exit
PB: predicated region body
PF: predicated region fallthrough
CT: control target
= control target key end

     0   :  { %v1402_v0 = vmov 1   ;;  %v2627_v1 = vmov 0   ;;  %v2658_v6 = vmov 6   ;;  %v2638_v8 = vmov 11   ;;  %s2621_s2 = inlined_call_operand.vmem [shape: f32[4,16,1], index: 2, kind: input, shape index: {}]   ;;  %s2622_s1 = inlined_call_operand.vmem [shape: f32[4,16,16], index: 1, kind: input, shape index: {}]   ;;  %s2623_s0 = inlined_call_operand.vmem [shape: f32[1,512], index: 0, kind: input, shape index: {}]   ;;  %s2624_s3 = inlined_call_operand.vmem [shape: f32[1,512], index: 3, kind: output, shape index: {}]  }
   0x1   :  { %1322 = vset.pattern.permute.xlu0 %v1402_v0  ;;  %1320 = vset.pattern.permute.xlu2 %v2627_v1  ;;  %v21_v2 = vld [vmem:[%s2621_s2] sm:$0xff]  ;;  %v1446_v3 = vld [vmem:[%s2622_s1 + $0x18] sm:$0xff]  ;;  %v1451_v4 = vld [vmem:[%s2622_s1 + $0x10] sm:$0xff]  ;;  %v2625_v9 = vmov 2   ;;  %v2632_v10 = vmov 14   ;;  %v2626_v11 = vmov 3  }
   0x2   :  { %1319 = vset.pattern.permute.xlu1 %v2627_v1  ;;  %127 = vperm.xlu0 %1322, %v1446_v3   ;;  %v22_v5 = vld [vmem:[%s2621_s2 + $0x8] sm:$0xff]  ;;  %v24_v7 = vld [vmem:[%s2621_s2 + $0x18] sm:$0xff]  ;;  %v14_v12 = vld [vmem:[%s2622_s1] sm:$0xff]  ;;  %v2631_v14 = vmov 4   ;;  %v2653_v15 = vmov 5   ;;  %v2668_v18 = vmov 7  }
   0x3   :  { %58 = vperm.xlu1 %1319, %v21_v2   ;;  %84 = vperm.xlu2 %1320, %v1451_v4   ;;  %v15_v13 = vld [vmem:[%s2622_s1 + $0x8] sm:$0xff]  ;;  %v23_v16 = vld [vmem:[%s2621_s2 + $0x10] sm:$0xff]  ;;  %v1510_v19 = vld [vmem:[%s2622_s1 + $0x20] sm:$0xff]  ;;  %v2677_v20 = vmov 8   ;;  %v2642_v21 = vmov 9   ;;  %v2640_v22 = vmov 10  }
   0x4   :  { %v1500_v17 = vld [vmem:[%s2622_s1 + $0x28] sm:$0xff]  ;;  %v2636_v24 = vmov 12   ;;  %v2634_v26 = vmov 13   ;;  %v2629_v30 = vmov 15   ;;  %v25_v36 = vld [vmem:[%s2621_s2 + $0x20] sm:$0xff]  ;;  %vm1287_vm0 = vcmask 1040384  }
   0x5   :  { %v26_v37 = vld [vmem:[%s2621_s2 + $0x28] sm:$0xff]  ;;  %v1597_v43 = vld [vmem:[%s2623_s0] sm:$0xf]  ;;  %vm1289_vm1 = vcmask 1042434   ;;  %vm1291_vm2 = vcmask 1041408  }
   0x6   :  { %v40_v44 = vperm.slane %v1597_v43, 0  ;;  %v41_v45 = vperm.slane %v1597_v43, 1  ;;  %v42_v46 = vperm.slane %v1597_v43, 2  ;;  %v43_v47 = vperm.slane %v1597_v43, 3 }
   0xa   :  { %1331 = vset.pattern.permute.xlu0 %v2658_v6 }
   0xb   :  { %63 = vperm.xlu1 %1319, %v22_v5   ;;  %89 = vperm.xlu2 %1320, %v1446_v3  }
   0xc   :  { %267 = vperm.xlu0 %1331, %v1446_v3  }
  0x13   :  { %111 = vperm.xlu1 %1319, %v24_v7   ;;  %1321 = vset.pattern.permute.xlu2 %v1402_v0 }
  0x14   :  { %1340 = vset.pattern.permute.xlu0 %v2638_v8  ;;  %123 = vperm.xlu2 %1321, %v1451_v4  }
  0x15   :  { %407 = vperm.xlu0 %1340, %v1446_v3  }
  0x1b   :  { %1323 = vset.pattern.permute.xlu1 %v2625_v9 }
  0x1c   :  { %151 = vperm.xlu1 %1323, %v1451_v4   ;;  %1324 = vset.pattern.permute.xlu2 %v2625_v9 }
  0x1d   :  { %1345 = vset.pattern.permute.xlu0 %v2632_v10  ;;  %155 = vperm.xlu2 %1324, %v1446_v3  }
  0x1e   :  { %487 = vperm.xlu0 %1345, %v1451_v4  }
  0x24   :  { %1325 = vset.pattern.permute.xlu1 %v2626_v11 }
  0x25   :  { %179 = vperm.xlu1 %1325, %v1451_v4   ;;  %1326 = vset.pattern.permute.xlu2 %v2626_v11 }
  0x26   :  { %1346 = vset.pattern.permute.xlu0 %v2627_v1  ;;  %183 = vperm.xlu2 %1326, %v1446_v3  }
  0x27   :  { %31 = vperm.xlu0 %1346, %v14_v12  }
  0x2d   :  { %1327 = vset.pattern.permute.xlu1 %v2631_v14 }
  0x2e   :  { %211 = vperm.xlu1 %1327, %v1446_v3   ;;  %1328 = vset.pattern.permute.xlu2 %v2653_v15 }
  0x2f   :  { %235 = vperm.xlu2 %1328, %v1451_v4   ;;  %36 = vperm.xlu0 %1346, %v15_v13  }
  0x36   :  { %1329 = vset.pattern.permute.xlu1 %v2653_v15 }
  0x37   :  { %239 = vperm.xlu1 %1329, %v1446_v3   ;;  %1330 = vset.pattern.permute.xlu2 %v2658_v6 }
  0x38   :  { %106 = vperm.xlu0 %1346, %v23_v16   ;;  %263 = vperm.xlu2 %1330, %v1451_v4  }
  0x3f   :  { %1332 = vset.pattern.permute.xlu1 %v2668_v18 }
  0x40   :  { %557 = vperm.xlu0 %1346, %v1500_v17   ;;  %291 = vperm.xlu1 %1332, %v1451_v4  }
  0x41   :  { %1333 = vset.pattern.permute.xlu2 %v2668_v18 }
  0x42   :  { %295 = vperm.xlu2 %1333, %v1446_v3  }
  0x48   :  { %1354 = vset.pattern.permute.xlu0 %v2625_v9  ;;  %1334 = vset.pattern.permute.xlu1 %v2677_v20 }
  0x49   :  { %619 = vperm.xlu0 %1354, %v1510_v19   ;;  %319 = vperm.xlu1 %1334, %v1451_v4  }
  0x4a   :  { %1335 = vset.pattern.permute.xlu2 %v2677_v20 }
  0x4b   :  { %323 = vperm.xlu2 %1335, %v1446_v3  }
  0x51   :  { %1355 = vset.pattern.permute.xlu0 %v2631_v14  ;;  %1336 = vset.pattern.permute.xlu1 %v2642_v21 }
  0x52   :  { %207 = vperm.xlu0 %1355, %v1451_v4   ;;  %351 = vperm.xlu1 %1336, %v1446_v3  }
  0x53   :  { %1337 = vset.pattern.permute.xlu2 %v2640_v22 }
  0x54   :  { %375 = vperm.xlu2 %1337, %v1451_v4  }
  0x5a   :  { %679 = vperm.xlu0 %1355, %v1500_v17   ;;  %1338 = vset.pattern.permute.xlu1 %v2640_v22 }
  0x5b   :  { %379 = vperm.xlu1 %1338, %v1446_v3  }
  0x5c   :  { %1339 = vset.pattern.permute.xlu2 %v2638_v8 }
  0x5d   :  { %403 = vperm.xlu2 %1339, %v1451_v4   ;;  %v1529_v23 = vpop.permute.xlu2 %84 }
  0x62   :  { %1364 = vset.pattern.permute.xlu0 %v2668_v18 }
  0x63   :  { %759 = vperm.xlu0 %1364, %v1510_v19   ;;  %1341 = vset.pattern.permute.xlu1 %v2636_v24 }
  0x64   :  { %431 = vperm.xlu1 %1341, %v1451_v4  }
  0x65   :  { %1342 = vset.pattern.permute.xlu2 %v2636_v24  ;;  %v1536_v25 = vpop.permute.xlu2 %89 }
  0x66   :  { %435 = vperm.xlu2 %1342, %v1446_v3  }
  0x6b   :  { %1365 = vset.pattern.permute.xlu0 %v2642_v21 }
  0x6c   :  { %347 = vperm.xlu0 %1365, %v1451_v4   ;;  %1343 = vset.pattern.permute.xlu1 %v2634_v26 }
  0x6d   :  { %459 = vperm.xlu1 %1343, %v1451_v4  }
  0x6e   :  { %1344 = vset.pattern.permute.xlu2 %v2634_v26  ;;  %v1544_v27 = vpop.permute.xlu2 %123 }
  0x6f   :  { %463 = vperm.xlu2 %1344, %v1446_v3  }
  0x74   :  { %819 = vperm.xlu0 %1365, %v1500_v17   ;;  %v1548_v28 = vpop.permute.xlu0 %127 }
  0x75   :  { %v59_v29 = vpop.permute.xlu1 %58  ;;  %1347 = vset.pattern.permute.xlu1 %v2632_v10 }
  0x76   :  { %491 = vperm.xlu1 %1347, %v1446_v3  }
  0x77   :  { %1348 = vset.pattern.permute.xlu2 %v2629_v30  ;;  %v1553_v31 = vpop.permute.xlu2 %155 }
  0x78   :  { %515 = vperm.xlu2 %1348, %v1451_v4  }
  0x7c   :  { %1374 = vset.pattern.permute.xlu0 %v2636_v24 }
  0x7d   :  { %v1557_v32 = vpop.permute.xlu1 %63  ;;  %899 = vperm.xlu0 %1374, %v1510_v19  }
  0x7e   :  { %1349 = vset.pattern.permute.xlu1 %v2629_v30  ;;  %v1561_v33 = vpop.permute.xlu0 %267 }
  0x7f   :  { %519 = vperm.xlu1 %1349, %v1446_v3  }
  0x80   :  { %1350 = vset.pattern.permute.xlu2 %v2627_v1  ;;  %v1565_v34 = vpop.permute.xlu2 %183 }
  0x81   :  { %552 = vperm.xlu2 %1350, %v1510_v19  }
  0x85   :  { %v1568_v35 = vpop.permute.xlu1 %111  ;;  %1379 = vset.pattern.permute.xlu0 %v2632_v10 }
  0x86   :  { %959 = vperm.xlu0 %1379, %v1500_v17  }
  0x87   :  { %1351 = vset.pattern.permute.xlu1 %v2627_v1  ;;  %v1579_v38 = vpop.permute.xlu0 %407 }
  0x88   :  { %574 = vperm.xlu1 %1351, %v25_v36  }
  0x89   :  { %579 = vperm.xlu2 %1350, %v26_v37   ;;  %v1581_v39 = vpop.permute.xlu2 %235 }
  0x8e   :  { %v1583_v40 = vpop.permute.xlu1 %151  ;;  %1384 = vset.pattern.permute.xlu0 %v1402_v0 }
  0x90   :  { %1352 = vset.pattern.permute.xlu1 %v1402_v0  ;;  %v1587_v41 = vpop.permute.xlu0 %487 }
  0x91   :  { %2694 = vst [vmem:[#allocation2_spill] sm:$0xff] %v1587_v41  ;;  %1353 = vset.pattern.permute.xlu2 %v1402_v0  ;;  %591 = vperm.xlu1 %1352, %v1510_v19  }
  0x92   :  { %595 = vperm.xlu2 %1353, %v1500_v17   ;;  %v1592_v42 = vpop.permute.xlu2 %263 }
  0x97   :  { %v1603_v48 = vpop.permute.xlu1 %179 }
  0x99   :  { %1356 = vset.pattern.permute.xlu1 %v2625_v9  ;;  %v32_v49 = vpop.permute.xlu0 %31 }
  0x9a   :  { %1357 = vset.pattern.permute.xlu2 %v2626_v11  ;;  %v48_v50 = vmul.f32 %v40_v44, %v32_v49  ;;  %v49_v51 = vmul.f32 %v41_v45, %v32_v49  ;;  %v50_v52 = vmul.f32 %v42_v46, %v32_v49  ;;  %v51_v53 = vmul.f32 %v43_v47, %v32_v49 }
  0x9b   :  { %623 = vperm.xlu1 %1356, %v1500_v17   ;;  %647 = vperm.xlu2 %1357, %v1510_v19  }
  0x9c   :  { %v66_v54 = vadd.f32 %v59_v29, %v48_v50  ;;  %v67_v55 = vadd.f32 %v59_v29, %v49_v51  ;;  %v68_v56 = vadd.f32 %v59_v29, %v50_v52  ;;  %v69_v57 = vadd.f32 %v59_v29, %v51_v53  ;;  %v296_v58 = vpop.permute.xlu2 %295 }
  0x9e   :  { %v1617_v59 = vmax.f32 %v66_v54, 0.0  ;;  %v1619_v60 = vmax.f32 %v67_v55, 0.0  ;;  %v1621_v61 = vmax.f32 %v68_v56, 0.0  ;;  %v1623_v62 = vmax.f32 %v69_v57, 0.0 }
  0xa0   :  { %v2647_v63 = vperm.slane %v1617_v59, 7  ;;  %v2646_v0 = vperm.slane %v1619_v60, 7  ;;  %v2645_v2 = vperm.slane %v1621_v61, 7  ;;  %v2644_v3 = vperm.slane %v1623_v62, 7  ;;  %v1629_v4 = vpop.permute.xlu1 %211 }
  0xa1   :  { %v92_v5 = vperm.slane %v1617_v59, 0  ;;  %v93_v7 = vperm.slane %v1619_v60, 0  ;;  %v94_v12 = vperm.slane %v1621_v61, 0  ;;  %v95_v13 = vperm.slane %v1623_v62, 0  ;;  %v1635_v16 = vpop.permute.xlu0 %36 }
  0xa2   :  { %v1639_v29 = vmul.f32 %v2647_v63, %v296_v58  ;;  %v1643_v36 = vmul.f32 %v2646_v0, %v296_v58  ;;  %v1647_v37 = vmul.f32 %v2645_v2, %v296_v58  ;;  %v1651_v49 = vmul.f32 %v2644_v3, %v296_v58 }
  0xa3   :  { %v100_v50 = vmul.f32 %v92_v5, %v1536_v25  ;;  %v101_v51 = vmul.f32 %v93_v7, %v1536_v25  ;;  %v102_v52 = vmul.f32 %v94_v12, %v1536_v25  ;;  %v103_v53 = vmul.f32 %v95_v13, %v1536_v25  ;;  %1358 = vset.pattern.permute.xlu1 %v2626_v11 }
  0xa4   :  { %v130_v54 = vperm.slane %v1617_v59, 1  ;;  %v131_v55 = vperm.slane %v1619_v60, 1  ;;  %v132_v56 = vperm.slane %v1621_v61, 1  ;;  %v133_v57 = vperm.slane %v1623_v62, 1  ;;  %1359 = vset.pattern.permute.xlu2 %v2631_v14  ;;  %651 = vperm.xlu1 %1358, %v1500_v17  }
  0xa5   :  { %v118_v58 = vadd.f32 %v1568_v35, %v100_v50  ;;  %v119_v9 = vadd.f32 %v1568_v35, %v101_v51  ;;  %v120_v25 = vadd.f32 %v1568_v35, %v102_v52  ;;  %v121_v11 = vadd.f32 %v1568_v35, %v103_v53  ;;  %675 = vperm.xlu2 %1359, %v1510_v19   ;;  %v1677_v1 = vpop.permute.xlu2 %323 }
  0xa6   :  { %v138_v30 = vmul.f32 %v130_v54, %v1548_v28  ;;  %v139_v14 = vmul.f32 %v131_v55, %v1548_v28  ;;  %v140_v50 = vmul.f32 %v132_v56, %v1548_v28  ;;  %v141_v35 = vmul.f32 %v133_v57, %v1548_v28 }
  0xa7   :  { %v2663_v51 = vperm.slane %v1617_v59, 2  ;;  %v2650_v52 = vperm.slane %v1619_v60, 2  ;;  %v2649_v53 = vperm.slane %v1621_v61, 2  ;;  %v2648_v10 = vperm.slane %v1623_v62, 2 }
  0xa8   :  { %v146_v26 = vadd.f32 %v138_v30, %v118_v58  ;;  %v147_v24 = vadd.f32 %v139_v14, %v119_v9  ;;  %v148_v8 = vadd.f32 %v140_v50, %v120_v25  ;;  %v149_v22 = vadd.f32 %v141_v35, %v121_v11 }
  0xa9   :  { %v166_v21 = vmul.f32 %v2663_v51, %v1553_v31  ;;  %v167_v28 = vmul.f32 %v2650_v52, %v1553_v31  ;;  %v168_v3 = vmul.f32 %v2649_v53, %v1553_v31  ;;  %v169_v2 = vmul.f32 %v2648_v10, %v1553_v31  ;;  %v1707_v30 = vpop.permute.xlu1 %239 }
  0xaa   :  { %v2660_v9 = vperm.slane %v1617_v59, 3  ;;  %v2659_v11 = vperm.slane %v1619_v60, 3  ;;  %v2652_v14 = vperm.slane %v1621_v61, 3  ;;  %v2651_v58 = vperm.slane %v1623_v62, 3  ;;  %v1713_v25 = vpop.permute.xlu0 %106 }
  0xab   :  { %v174_v50 = vadd.f32 %v166_v21, %v146_v26  ;;  %v175_v35 = vadd.f32 %v167_v28, %v147_v24  ;;  %v176_v0 = vadd.f32 %v168_v3, %v148_v8  ;;  %v177_v63 = vadd.f32 %v169_v2, %v149_v22 }
  0xac   :  { %v194_v31 = vmul.f32 %v2660_v9, %v1565_v34  ;;  %v195_v10 = vmul.f32 %v2659_v11, %v1565_v34  ;;  %v196_v53 = vmul.f32 %v2652_v14, %v1565_v34  ;;  %v197_v52 = vmul.f32 %v2651_v58, %v1565_v34  ;;  %1360 = vset.pattern.permute.xlu1 %v2653_v15 }
  0xad   :  { %v2657_v8 = vperm.slane %v1617_v59, 4  ;;  %v2656_v21 = vperm.slane %v1619_v60, 4  ;;  %v2655_v22 = vperm.slane %v1621_v61, 4  ;;  %v2654_v24 = vperm.slane %v1623_v62, 4  ;;  %1361 = vset.pattern.permute.xlu2 %v2653_v15  ;;  %703 = vperm.xlu1 %1360, %v1510_v19  }
  0xae   :  { %v202_v26 = vadd.f32 %v194_v31, %v174_v50  ;;  %v203_v2 = vadd.f32 %v195_v10, %v175_v35  ;;  %v204_v3 = vadd.f32 %v196_v53, %v176_v0  ;;  %v205_v28 = vadd.f32 %v197_v52, %v177_v63  ;;  %707 = vperm.xlu2 %1361, %v1500_v17   ;;  %v1735_v34 = vpop.permute.xlu2 %375 }
  0xaf   :  { %v222_v58 = vmul.f32 %v2657_v8, %v1629_v4  ;;  %v223_v14 = vmul.f32 %v2656_v21, %v1629_v4  ;;  %v224_v15 = vmul.f32 %v2655_v22, %v1629_v4  ;;  %v225_v10 = vmul.f32 %v2654_v24, %v1629_v4 }
  0xb0   :  { %v52_v63 = vmul.f32 %v40_v44, %v1635_v16  ;;  %v53_v0 = vmul.f32 %v41_v45, %v1635_v16  ;;  %v54_v52 = vmul.f32 %v42_v46, %v1635_v16  ;;  %v55_v53 = vmul.f32 %v43_v47, %v1635_v16 }
  0xb1   :  { %v230_v50 = vadd.f32 %v222_v58, %v202_v26  ;;  %v231_v35 = vadd.f32 %v223_v14, %v203_v2  ;;  %v232_v31 = vadd.f32 %v224_v15, %v204_v3  ;;  %v233_v4 = vadd.f32 %v225_v10, %v205_v28 }
  0xb2   :  { %v70_v24 = vadd.f32 %v1557_v32, %v52_v63  ;;  %v71_v44 = vadd.f32 %v1557_v32, %v53_v0  ;;  %v72_v22 = vadd.f32 %v1557_v32, %v54_v52  ;;  %v73_v45 = vadd.f32 %v1557_v32, %v55_v53  ;;  %v1765_v21 = vpop.permute.xlu1 %291  ;;  %v1767_v8 = vpop.permute.xlu0 %557 }
  0xb3   :  { %2695 = vst [vmem:[#allocation3_spill] sm:$0xff] %v1767_v8  ;;  %v242_v46 = vperm.slane %v1617_v59, 5  ;;  %v243_v43 = vperm.slane %v1619_v60, 5  ;;  %v244_v47 = vperm.slane %v1621_v61, 5  ;;  %v245_v15 = vperm.slane %v1623_v62, 5 }
  0xb4   :  { %v1773_v16 = vmax.f32 %v70_v24, 0.0  ;;  %v1775_v14 = vmax.f32 %v71_v44, 0.0  ;;  %v1777_v58 = vmax.f32 %v72_v22, 0.0  ;;  %v1779_v26 = vmax.f32 %v73_v45, 0.0 }
  0xb5   :  { %v1782_v32 = vmul.f32 %v242_v46, %v1581_v39  ;;  %v1785_v2 = vmul.f32 %v243_v43, %v1581_v39  ;;  %v1788_v3 = vmul.f32 %v244_v47, %v1581_v39  ;;  %v1791_v28 = vmul.f32 %v245_v15, %v1581_v39  ;;  %1362 = vset.pattern.permute.xlu1 %v2658_v6 }
  0xb6   :  { %v2661_v24 = vperm.slane %v1773_v16, 0  ;;  %v2662_v22 = vperm.slane %v1775_v14, 0  ;;  %v2664_v10 = vperm.slane %v1777_v58, 0  ;;  %v2667_v63 = vperm.slane %v1779_v26, 0  ;;  %1363 = vset.pattern.permute.xlu2 %v2658_v6  ;;  %731 = vperm.xlu1 %1362, %v1510_v19  }
  0xb7   :  { %v250_v0 = vmul.f32 %v242_v46, %v1707_v30  ;;  %v251_v52 = vmul.f32 %v243_v43, %v1707_v30  ;;  %v252_v39 = vmul.f32 %v244_v47, %v1707_v30  ;;  %v253_v53 = vmul.f32 %v245_v15, %v1707_v30  ;;  %735 = vperm.xlu2 %1363, %v1500_v17   ;;  %v1805_v44 = vpop.permute.xlu2 %403 }
  0xb8   :  { %v1810_v45 = vmul.f32 %v2661_v24, %v1677_v1  ;;  %v1815_v6 = vmul.f32 %v2662_v22, %v1677_v1  ;;  %v1820_v46 = vmul.f32 %v2664_v10, %v1677_v1  ;;  %v1825_v30 = vmul.f32 %v2667_v63, %v1677_v1 }
  0xb9   :  { %v258_v43 = vadd.f32 %v250_v0, %v230_v50  ;;  %v259_v47 = vadd.f32 %v251_v52, %v231_v35  ;;  %v260_v15 = vadd.f32 %v252_v39, %v232_v31  ;;  %v261_v11 = vadd.f32 %v253_v53, %v233_v4 }
  0xba   :  { %v2665_v9 = vperm.slane %v1617_v59, 6  ;;  %v2666_v24 = vperm.slane %v1619_v60, 6  ;;  %v2674_v22 = vperm.slane %v1621_v61, 6  ;;  %v2673_v51 = vperm.slane %v1623_v62, 6 }
  0xbb   :  { %v96_v10 = vmul.f32 %v92_v5, %v1529_v23  ;;  %v97_v1 = vmul.f32 %v93_v7, %v1529_v23  ;;  %v98_v50 = vmul.f32 %v94_v12, %v1529_v23  ;;  %v99_v35 = vmul.f32 %v95_v13, %v1529_v23  ;;  %v320_v31 = vpop.permute.xlu1 %319  ;;  %v1843_v4 = vpop.permute.xlu0 %619 }
  0xbc   :  { %2696 = vst [vmem:[#allocation4_spill] sm:$0xff] %v1843_v4  ;;  %v278_v0 = vmul.f32 %v2665_v9, %v1561_v33  ;;  %v279_v5 = vmul.f32 %v2666_v24, %v1561_v33  ;;  %v280_v7 = vmul.f32 %v2674_v22, %v1561_v33  ;;  %v281_v12 = vmul.f32 %v2673_v51, %v1561_v33 }
  0xbd   :  { %v114_v23 = vadd.f32 %v1713_v25, %v96_v10  ;;  %v115_v13 = vadd.f32 %v1713_v25, %v97_v1  ;;  %v116_v52 = vadd.f32 %v1713_v25, %v98_v50  ;;  %v117_v39 = vadd.f32 %v1713_v25, %v99_v35 }
  0xbe   :  { %v1861_v53 = vadd.f32 %v278_v0, %v258_v43  ;;  %v1863_v9 = vadd.f32 %v279_v5, %v259_v47  ;;  %v1865_v24 = vadd.f32 %v280_v7, %v260_v15  ;;  %v1867_v63 = vadd.f32 %v281_v12, %v261_v11  ;;  %1366 = vset.pattern.permute.xlu1 %v2668_v18 }
  0xbf   :  { %v134_v33 = vmul.f32 %v130_v54, %v1544_v27  ;;  %v135_v10 = vmul.f32 %v131_v55, %v1544_v27  ;;  %v136_v25 = vmul.f32 %v132_v56, %v1544_v27  ;;  %v137_v43 = vmul.f32 %v133_v57, %v1544_v27  ;;  %1367 = vset.pattern.permute.xlu2 %v2677_v20 }
  0xc0   :  { %v2697_v11 = vperm.slane %v1617_v59, 2  ;;  %v2698_v54 = vperm.slane %v1619_v60, 2  ;;  %v2699_v55 = vperm.slane %v1621_v61, 2  ;;  %v2700_v56 = vperm.slane %v1623_v62, 2  ;;  %763 = vperm.xlu1 %1366, %v1500_v17   ;;  %v436_v27 = vpop.permute.xlu2 %435  ;;  %787 = vperm.xlu2 %1367, %v1510_v19  }
  0xc1   :  { %v142_v57 = vadd.f32 %v134_v33, %v114_v23  ;;  %v143_v35 = vadd.f32 %v135_v10, %v115_v13  ;;  %v144_v0 = vadd.f32 %v136_v25, %v116_v52  ;;  %v145_v5 = vadd.f32 %v137_v43, %v117_v39 }
  0xc2   :  { %v162_v47 = vmul.f32 %v2697_v11, %v1583_v40  ;;  %v163_v15 = vmul.f32 %v2698_v54, %v1583_v40  ;;  %v164_v1 = vmul.f32 %v2699_v55, %v1583_v40  ;;  %v165_v50 = vmul.f32 %v2700_v56, %v1583_v40 }
  0xc3   :  { %v2672_v7 = vperm.slane %v1773_v16, 2  ;;  %v2671_v12 = vperm.slane %v1775_v14, 2  ;;  %v2670_v11 = vperm.slane %v1777_v58, 2  ;;  %v2669_v54 = vperm.slane %v1779_v26, 2 }
  0xc4   :  { %v170_v55 = vadd.f32 %v162_v47, %v142_v57  ;;  %v171_v18 = vadd.f32 %v163_v15, %v143_v35  ;;  %v172_v40 = vadd.f32 %v164_v1, %v144_v0  ;;  %v173_v56 = vadd.f32 %v165_v50, %v145_v5  ;;  %v208_v33 = vpop.permute.xlu0 %207  ;;  %v1921_v10 = vpop.permute.xlu1 %351 }
  0xc5   :  { %v1904_v23 = vmul.f32 %v2672_v7, %v1735_v34  ;;  %v1909_v13 = vmul.f32 %v2671_v12, %v1735_v34  ;;  %v1914_v52 = vmul.f32 %v2670_v11, %v1735_v34  ;;  %v1919_v39 = vmul.f32 %v2669_v54, %v1735_v34 }
  0xc6   :  { %v2705_v25 = vperm.slane %v1617_v59, 7  ;;  %v2706_v47 = vperm.slane %v1619_v60, 7  ;;  %v2707_v1 = vperm.slane %v1621_v61, 7  ;;  %v2708_v34 = vperm.slane %v1623_v62, 7 }
  0xc7   :  { %2701 = vst [vmem:[#allocation5_spill] sm:$0xff] %v1904_v23  ;;  %v410_v35 = vperm.slane %v1773_v16, 3  ;;  %v411_v0 = vperm.slane %v1775_v14, 3  ;;  %v412_v5 = vperm.slane %v1777_v58, 3  ;;  %v2711_v12 = vperm.slane %v1777_v58, 0 }
  0xc8   :  { %2702 = vst [vmem:[#allocation6_spill] sm:$0xff] %v1909_v13  ;;  %v1926_v43 = vmul.f32 %v2705_v25, %v1765_v21  ;;  %v1931_v15 = vmul.f32 %v2706_v47, %v1765_v21  ;;  %v1936_v50 = vmul.f32 %v2707_v1, %v1765_v21  ;;  %v1941_v57 = vmul.f32 %v2708_v34, %v1765_v21 }
  0xc9   :  { %2703 = vst [vmem:[#allocation7_spill] sm:$0xff] %v1914_v52  ;;  %v413_v25 = vperm.slane %v1779_v26, 3  ;;  %v2709_v47 = vperm.slane %v1773_v16, 0  ;;  %v2710_v1 = vperm.slane %v1775_v14, 0  ;;  %v1957_v21 = vmul.f32 %v2711_v12, %v320_v31  ;;  %1368 = vset.pattern.permute.xlu1 %v2677_v20 }
  0xca   :  { %2704 = vst [vmem:[#allocation8_spill] sm:$0xff] %v1919_v39  ;;  %v2713_v34 = vperm.slane %v1779_v26, 0  ;;  %v1964_v51 = vmul.f32 %v410_v35, %v1805_v44  ;;  %v1967_v22 = vmul.f32 %v411_v0, %v1805_v44  ;;  %v1977_v12 = vmul.f32 %v410_v35, %v1579_v38  ;;  %791 = vperm.xlu1 %1368, %v1500_v17  }
  0xcb   :  { %v1949_v54 = vmul.f32 %v2709_v47, %v320_v31  ;;  %v1953_v11 = vmul.f32 %v2710_v1, %v320_v31  ;;  %2712 = vst [vmem:[#allocation9_spill] sm:$0xff] %v1957_v21  ;;  %v1970_v47 = vmul.f32 %v412_v5, %v1805_v44  ;;  %v1973_v1 = vmul.f32 %v413_v25, %v1805_v44 }
  0xcc   :  { %v1961_v7 = vmul.f32 %v2713_v34, %v320_v31  ;;  %2715 = vst [vmem:[#allocation11_spill] sm:$0xff] %v1964_v51  ;;  %v1980_v31 = vmul.f32 %v411_v0, %v1579_v38  ;;  %v1983_v34 = vmul.f32 %v412_v5, %v1579_v38  ;;  %v1986_v4 = vmul.f32 %v413_v25, %v1579_v38 }
  0xcd   :  { %2716 = vst [vmem:[#allocation12_spill] sm:$0xff] %v1967_v22  ;;  %v2719_v8 = vmov 9   ;;  %v2720_v38 = vperm.slane %v1617_v59, 3  ;;  %v2721_v5 = vperm.slane %v1619_v60, 3  ;;  %v2722_v44 = vperm.slane %v1621_v61, 3 }
  0xce   :  { %2714 = vst [vmem:[#allocation10_spill] sm:$0xff] %v1961_v7  ;;  %1369 = vset.pattern.permute.xlu2 %v2719_v8  ;;  %v2723_v35 = vperm.slane %v1623_v62, 3  ;;  %v2724_v8 = vperm.slane %v1773_v16, 4  ;;  %v2726_v51 = vperm.slane %v1775_v14, 4  ;;  %v2734_v21 = vperm.slane %v1623_v62, 4 }
  0xcf   :  { %2717 = vst [vmem:[#allocation13_spill] sm:$0xff] %v1970_v47  ;;  %v1989_v47 = vpop.permute.xlu2 %463  ;;  %815 = vperm.xlu2 %1369, %v1510_v19   ;;  %v190_v0 = vmul.f32 %v2720_v38, %v1603_v48  ;;  %v191_v25 = vmul.f32 %v2721_v5, %v1603_v48  ;;  %v192_v20 = vmul.f32 %v2722_v44, %v1603_v48  ;;  %v2728_v38 = vperm.slane %v1777_v58, 4  ;;  %v2025_v44 = vpop.permute.xlu0 %679 }
  0xd0   :  { %2718 = vst [vmem:[#allocation14_spill] sm:$0xff] %v1973_v1  ;;  %v193_v1 = vmul.f32 %v2723_v35, %v1603_v48  ;;  %v2011_v22 = vmul.f32 %v2724_v8, %v436_v27  ;;  %v2015_v41 = vmul.f32 %v2726_v51, %v436_v27  ;;  %v2730_v5 = vperm.slane %v1779_v26, 4  ;;  %v380_v8 = vpop.permute.xlu1 %379 }
  0xd1   :  { %v2019_v39 = vmul.f32 %v2728_v38, %v436_v27  ;;  %v198_v13 = vadd.f32 %v190_v0, %v170_v55  ;;  %v199_v48 = vadd.f32 %v191_v25, %v171_v18  ;;  %v200_v35 = vadd.f32 %v192_v20, %v172_v40 }
  0xd2   :  { %2725 = vst [vmem:[#allocation15_spill] sm:$0xff] %v2011_v22  ;;  %v2023_v52 = vmul.f32 %v2730_v5, %v436_v27  ;;  %v201_v23 = vadd.f32 %v193_v1, %v173_v56  ;;  %v2731_v22 = vperm.slane %v1617_v59, 4  ;;  %v2732_v51 = vperm.slane %v1619_v60, 4 }
  0xd3   :  { %2727 = vst [vmem:[#allocation16_spill] sm:$0xff] %v2015_v41  ;;  %v2733_v38 = vperm.slane %v1621_v61, 4  ;;  %v221_v27 = vmul.f32 %v2734_v21, %v208_v33  ;;  %v2735_v5 = vperm.slane %v1617_v59, 6  ;;  %v2736_v18 = vperm.slane %v1619_v60, 6 }
  0xd4   :  { %2729 = vst [vmem:[#allocation17_spill] sm:$0xff] %v2019_v39  ;;  %v218_v7 = vmul.f32 %v2731_v22, %v208_v33  ;;  %v219_v41 = vmul.f32 %v2732_v51, %v208_v33  ;;  %v2737_v22 = vperm.slane %v1621_v61, 6  ;;  %v2738_v56 = vperm.slane %v1623_v62, 6 }
  0xd5   :  { %v220_v39 = vmul.f32 %v2733_v38, %v208_v33  ;;  %v274_v55 = vmul.f32 %v2735_v5, %v1592_v42  ;;  %v275_v20 = vmul.f32 %v2736_v18, %v1592_v42  ;;  %v229_v33 = vadd.f32 %v221_v27, %v201_v23 }
  0xd6   :  { %v276_v40 = vmul.f32 %v2737_v22, %v1592_v42  ;;  %v277_v1 = vmul.f32 %v2738_v56, %v1592_v42  ;;  %v226_v0 = vadd.f32 %v218_v7, %v198_v13  ;;  %v227_v25 = vadd.f32 %v219_v41, %v199_v48 }
  0xd7   :  { %v228_v51 = vadd.f32 %v220_v39, %v200_v35  ;;  %v314_v59 = vadd.f32 %v1639_v29, %v1861_v53  ;;  %v315_v21 = vadd.f32 %v1643_v36, %v1863_v9  ;;  %v316_v60 = vadd.f32 %v1647_v37, %v1865_v24 }
  0xd8   :  { %v317_v61 = vadd.f32 %v1651_v49, %v1867_v63  ;;  %v254_v38 = vadd.f32 %v1782_v32, %v226_v0  ;;  %v255_v42 = vadd.f32 %v1785_v2, %v227_v25  ;;  %v257_v62 = vadd.f32 %v1791_v28, %v229_v33  ;;  %v516_v49 = vpop.permute.xlu2 %515  ;;  %v432_v39 = vpop.permute.xlu1 %431 }
  0xd9   :  { %v256_v41 = vadd.f32 %v1788_v3, %v228_v51  ;;  %v2739_v7 = vmov 10   ;;  %v342_v29 = vadd.f32 %v1810_v45, %v314_v59  ;;  %v343_v36 = vadd.f32 %v1815_v6, %v315_v21 }
  0xda   :  { %1370 = vset.pattern.permute.xlu1 %v2739_v7  ;;  %v344_v9 = vadd.f32 %v1820_v46, %v316_v60  ;;  %v345_v37 = vadd.f32 %v1825_v30, %v317_v61  ;;  %1371 = vset.pattern.permute.xlu2 %v2739_v7  ;;  %v282_v32 = vadd.f32 %v274_v55, %v254_v38  ;;  %v354_v3 = vperm.slane %v1773_v16, 1  ;;  %v2071_v46 = vpop.permute.xlu0 %759 }
  0xdb   :  { %v283_v24 = vadd.f32 %v275_v20, %v255_v42  ;;  %v284_v2 = vadd.f32 %v276_v40, %v256_v41  ;;  %v285_v63 = vadd.f32 %v277_v1, %v257_v62  ;;  %843 = vperm.xlu1 %1370, %v1510_v19   ;;  %v355_v28 = vperm.slane %v1775_v14, 1  ;;  %847 = vperm.xlu2 %1371, %v1500_v17  }
  0xdc   :  { %v356_v45 = vperm.slane %v1777_v58, 1  ;;  %v357_v6 = vperm.slane %v1779_v26, 1  ;;  %v466_v30 = vperm.slane %v1773_v16, 5  ;;  %v467_v53 = vperm.slane %v1775_v14, 5 }
  0xdd   :  { %v468_v23 = vperm.slane %v1777_v58, 5  ;;  %v469_v13 = vperm.slane %v1779_v26, 5  ;;  %v362_v48 = vmul.f32 %v354_v3, %v1921_v10  ;;  %v363_v35 = vmul.f32 %v355_v28, %v1921_v10 }
  0xde   :  { %v364_v27 = vmul.f32 %v356_v45, %v1921_v10  ;;  %v365_v5 = vmul.f32 %v357_v6, %v1921_v10  ;;  %v2084_v55 = vmul.f32 %v466_v30, %v1989_v47  ;;  %v2089_v18 = vmul.f32 %v467_v53, %v1989_v47  ;;  %v2104_v10 = vld [vmem:[%s2622_s1 + $0x30] sm:$0xff] }
  0xdf   :  { %v2094_v20 = vmul.f32 %v468_v23, %v1989_v47  ;;  %v2099_v22 = vmul.f32 %v469_v13, %v1989_v47  ;;  %v370_v40 = vadd.f32 %v362_v48, %v342_v29  ;;  %v371_v56 = vadd.f32 %v363_v35, %v343_v36  ;;  %1041 = vperm.xlu0 %1384, %v2104_v10  }
  0xe0   :  { %v372_v1 = vadd.f32 %v364_v27, %v344_v9  ;;  %v373_v0 = vadd.f32 %v365_v5, %v345_v37  ;;  %v2740_v25 = vperm.slane %v1773_v16, 2  ;;  %v2741_v33 = vperm.slane %v1775_v14, 2  ;;  %v2119_v29 = vpop.permute.xlu2 %552 }
  0xe1   :  { %v2742_v47 = vperm.slane %v1777_v58, 2  ;;  %v2743_v60 = vperm.slane %v1779_v26, 2  ;;  %v2682_v38 = vperm.slane %v1773_v16, 7  ;;  %v2681_v42 = vperm.slane %v1775_v14, 7 }
  0xe2   :  { %v390_v51 = vmul.f32 %v2740_v25, %v380_v8  ;;  %v391_v59 = vmul.f32 %v2741_v33, %v380_v8  ;;  %v2680_v41 = vperm.slane %v1777_v58, 7  ;;  %v2679_v62 = vperm.slane %v1779_v26, 7 }
  0xe3   :  { %v392_v21 = vmul.f32 %v2742_v47, %v380_v8  ;;  %v393_v61 = vmul.f32 %v2743_v60, %v380_v8  ;;  %v2744_v35 = vmov 11   ;;  %v2124_v27 = vmul.f32 %v2682_v38, %v516_v49 }
  0xe4   :  { %v398_v36 = vadd.f32 %v390_v51, %v370_v40  ;;  %v399_v9 = vadd.f32 %v391_v59, %v371_v56  ;;  %1372 = vset.pattern.permute.xlu1 %v2744_v35  ;;  %v2128_v8 = vmul.f32 %v2681_v42, %v516_v49  ;;  %v2132_v5 = vmul.f32 %v2680_v41, %v516_v49  ;;  %v348_v51 = vpop.permute.xlu0 %347  ;;  %v2751_v42 = vld [vmem:[#allocation10_spill] sm:$0xff] }
  0xe5   :  { %v400_v37 = vadd.f32 %v392_v21, %v372_v1  ;;  %v401_v48 = vadd.f32 %v393_v61, %v373_v0  ;;  %v2136_v40 = vmul.f32 %v2679_v62, %v516_v49  ;;  %1373 = vset.pattern.permute.xlu2 %v2744_v35  ;;  %871 = vperm.xlu1 %1372, %v1510_v19   ;;  %v2745_v33 = vperm.slane %v1773_v16, 4 }
  0xe6   :  { %v426_v56 = vadd.f32 %v1977_v12, %v398_v36  ;;  %v427_v1 = vadd.f32 %v1980_v31, %v399_v9  ;;  %v2746_v47 = vperm.slane %v1775_v14, 4  ;;  %v2747_v21 = vperm.slane %v1777_v58, 4  ;;  %875 = vperm.xlu2 %1373, %v1500_v17   ;;  %v460_v31 = vpop.permute.xlu1 %459 }
  0xe7   :  { %v428_v0 = vadd.f32 %v1983_v34, %v400_v37  ;;  %v429_v25 = vadd.f32 %v1986_v4, %v401_v48  ;;  %v442_v59 = vmul.f32 %v2745_v33, %v432_v39  ;;  %v2748_v12 = vperm.slane %v1779_v26, 4 }
  0xe8   :  { %v443_v49 = vmul.f32 %v2746_v47, %v432_v39  ;;  %v444_v60 = vmul.f32 %v2747_v21, %v432_v39  ;;  %v310_v4 = vadd.f32 %v1926_v43, %v282_v32  ;;  %v311_v34 = vadd.f32 %v1931_v15, %v283_v24  ;;  %v2171_v32 = vpop.permute.xlu2 %579 }
  0xe9   :  { %v445_v61 = vmul.f32 %v2748_v12, %v432_v39  ;;  %v312_v36 = vadd.f32 %v1936_v50, %v284_v2  ;;  %v313_v9 = vadd.f32 %v1941_v57, %v285_v63  ;;  %v358_v37 = vmul.f32 %v354_v3, %v348_v51  ;;  %v2750_v12 = vld [vmem:[#allocation9_spill] sm:$0xff] }
  0xea   :  { %v359_v48 = vmul.f32 %v355_v28, %v348_v51  ;;  %v360_v33 = vmul.f32 %v356_v45, %v348_v51  ;;  %v361_v47 = vmul.f32 %v357_v6, %v348_v51  ;;  %v2749_v62 = vmov 6   ;;  %v2755_v51 = vld [vmem:[#allocation8_spill] sm:$0xff] }
  0xeb   :  { %1389 = vset.pattern.permute.xlu0 %v2749_v62  ;;  %v338_v21 = vadd.f32 %v1949_v54, %v310_v4  ;;  %v339_v39 = vadd.f32 %v1953_v11, %v311_v34  ;;  %v340_v41 = vadd.f32 %v2750_v12, %v312_v36  ;;  %v341_v43 = vadd.f32 %v2751_v42, %v313_v9  ;;  %v2754_v62 = vld [vmem:[#allocation7_spill] sm:$0xff]  ;;  %v2761_v12 = vld [vmem:[#allocation13_spill] sm:$0xff] }
  0xec   :  { %1121 = vperm.xlu0 %1389, %v2104_v10   ;;  %v470_v15 = vmul.f32 %v466_v30, %v460_v31  ;;  %v471_v50 = vmul.f32 %v467_v53, %v460_v31  ;;  %v472_v57 = vmul.f32 %v468_v23, %v460_v31  ;;  %v473_v54 = vmul.f32 %v469_v13, %v460_v31  ;;  %v2752_v30 = vld [vmem:[#allocation5_spill] sm:$0xff]  ;;  %v2753_v23 = vld [vmem:[#allocation6_spill] sm:$0xff] }
  0xed   :  { %v366_v11 = vadd.f32 %v358_v37, %v338_v21  ;;  %v367_v24 = vadd.f32 %v359_v48, %v339_v39  ;;  %v368_v2 = vadd.f32 %v360_v33, %v340_v41  ;;  %v369_v63 = vadd.f32 %v361_v47, %v341_v43  ;;  %v2757_v41 = vld [vmem:[#allocation2_spill] sm:$0xff]  ;;  %v2759_v33 = vld [vmem:[#allocation11_spill] sm:$0xff]  ;;  %v2760_v21 = vld [vmem:[#allocation12_spill] sm:$0xff] }
  0xee   :  { %v494_v3 = vperm.slane %v1773_v16, 6  ;;  %v495_v28 = vperm.slane %v1775_v14, 6  ;;  %v496_v45 = vperm.slane %v1777_v58, 6  ;;  %v497_v6 = vperm.slane %v1779_v26, 6 }
  0xef   :  { %v394_v53 = vadd.f32 %v2752_v30, %v366_v11  ;;  %v395_v42 = vadd.f32 %v2753_v23, %v367_v24  ;;  %v396_v13 = vadd.f32 %v2754_v62, %v368_v2  ;;  %v397_v31 = vadd.f32 %v2755_v51, %v369_v63  ;;  %v2762_v11 = vld [vmem:[#allocation14_spill] sm:$0xff]  ;;  %v492_v2 = vpop.permute.xlu1 %491  ;;  %v2763_v63 = vld [vmem:[#allocation15_spill] sm:$0xff]  ;;  %v2764_v23 = vld [vmem:[#allocation16_spill] sm:$0xff] }
  0xf0   :  { %v2756_v4 = vmov 12   ;;  %v498_v34 = vmul.f32 %v494_v3, %v2757_v41  ;;  %v499_v36 = vmul.f32 %v495_v28, %v2757_v41  ;;  %v500_v9 = vmul.f32 %v496_v45, %v2757_v41  ;;  %v2765_v51 = vld [vmem:[#allocation17_spill] sm:$0xff] }
  0xf1   :  { %1375 = vset.pattern.permute.xlu1 %v2756_v4  ;;  %v501_v37 = vmul.f32 %v497_v6, %v2757_v41  ;;  %v2758_v48 = vmov 13   ;;  %v422_v47 = vadd.f32 %v2759_v33, %v394_v53  ;;  %v423_v39 = vadd.f32 %v2760_v21, %v395_v42 }
  0xf2   :  { %1376 = vset.pattern.permute.xlu2 %v2758_v48  ;;  %v424_v43 = vadd.f32 %v2761_v12, %v396_v13  ;;  %v425_v24 = vadd.f32 %v2762_v11, %v397_v31  ;;  %903 = vperm.xlu1 %1375, %v1500_v17   ;;  %v454_v30 = vadd.f32 %v2763_v63, %v426_v56 }
  0xf3   :  { %927 = vperm.xlu2 %1376, %v1510_v19   ;;  %v455_v62 = vadd.f32 %v2764_v23, %v427_v1  ;;  %v456_v41 = vadd.f32 %v2765_v51, %v428_v0  ;;  %v457_v38 = vadd.f32 %v2023_v52, %v429_v25  ;;  %v450_v53 = vadd.f32 %v442_v59, %v422_v47  ;;  %v596_v25 = vpop.permute.xlu2 %595 }
  0xf4   :  { %v451_v33 = vadd.f32 %v443_v49, %v423_v39  ;;  %v452_v42 = vadd.f32 %v444_v60, %v424_v43  ;;  %v453_v21 = vadd.f32 %v445_v61, %v425_v24  ;;  %1394 = vset.pattern.permute.xlu0 %v2744_v35  ;;  %v482_v13 = vadd.f32 %v2084_v55, %v454_v30 }
  0xf5   :  { %v483_v31 = vadd.f32 %v2089_v18, %v455_v62  ;;  %v484_v12 = vadd.f32 %v2094_v20, %v456_v41  ;;  %v485_v56 = vadd.f32 %v2099_v22, %v457_v38  ;;  %1201 = vperm.xlu0 %1394, %v2104_v10   ;;  %v478_v1 = vadd.f32 %v470_v15, %v450_v53  ;;  %v2772_v62 = vld [vmem:[#allocation3_spill] sm:$0xff] }
  0xf6   :  { %v479_v0 = vadd.f32 %v471_v50, %v451_v33  ;;  %v480_v11 = vadd.f32 %v472_v57, %v452_v42  ;;  %v481_v52 = vadd.f32 %v473_v54, %v453_v21  ;;  %v502_v59 = vmul.f32 %v494_v3, %v492_v2 }
  0xf7   :  { %v503_v49 = vmul.f32 %v495_v28, %v492_v2  ;;  %v504_v60 = vmul.f32 %v496_v45, %v492_v2  ;;  %v505_v61 = vmul.f32 %v497_v6, %v492_v2  ;;  %v506_v35 = vadd.f32 %v498_v34, %v478_v1  ;;  %v520_v54 = vpop.permute.xlu1 %519 }
  0xf8   :  { %v507_v47 = vadd.f32 %v499_v36, %v479_v0  ;;  %v508_v55 = vadd.f32 %v500_v9, %v480_v11  ;;  %v509_v39 = vadd.f32 %v501_v37, %v481_v52  ;;  %v510_v18 = vadd.f32 %v502_v59, %v482_v13 }
  0xf9   :  { %v511_v43 = vadd.f32 %v503_v49, %v483_v31  ;;  %v512_v20 = vadd.f32 %v504_v60, %v484_v12  ;;  %v513_v24 = vadd.f32 %v505_v61, %v485_v56  ;;  %v534_v22 = vadd.f32 %v2124_v27, %v506_v35 }
  0xfa   :  { %v535_v38 = vadd.f32 %v2128_v8, %v507_v47  ;;  %v536_v15 = vadd.f32 %v2132_v5, %v508_v55  ;;  %v537_v50 = vadd.f32 %v2136_v40, %v509_v39  ;;  %1377 = vset.pattern.permute.xlu1 %v2758_v48  ;;  %v2766_v57 = vmov 14   ;;  %v1400_v47 = vld [vmem:[%s2622_s1 + $0x20] sm:$0xff]  ;;  %v1401_v55 = vld [vmem:[%s2622_s1 + $0x28] sm:$0xff] }
  0xfb   :  { %1378 = vset.pattern.permute.xlu2 %v2766_v57  ;;  %931 = vperm.xlu1 %1377, %v1500_v17   ;;  %v2210_v3 = vmax.f32 %v534_v22, 0.0  ;;  %v2767_v8 = vperm.slane %v1773_v16, 7  ;;  %v2768_v40 = vperm.slane %v1775_v14, 7  ;;  %v2769_v34 = vperm.slane %v1777_v58, 7 }
  0xfc   :  { %v2212_v28 = vmax.f32 %v535_v38, 0.0  ;;  %v2214_v45 = vmax.f32 %v536_v15, 0.0  ;;  %v2216_v27 = vmax.f32 %v537_v50, 0.0  ;;  %955 = vperm.xlu2 %1378, %v1510_v19   ;;  %v2770_v36 = vperm.slane %v1779_v26, 7  ;;  %v648_v26 = vpop.permute.xlu2 %647 }
  0xfd   :  { %v530_v5 = vmul.f32 %v2767_v8, %v520_v54  ;;  %v531_v6 = vmul.f32 %v2768_v40, %v520_v54  ;;  %v532_v17 = vmul.f32 %v2769_v34, %v520_v54  ;;  %v2771_v37 = vmov 15  }
  0xfe   :  { %v533_v9 = vmul.f32 %v2770_v36, %v520_v54  ;;  %1399 = vset.pattern.permute.xlu0 %v2771_v37  ;;  %v560_v2 = vperm.slane %v2210_v3, 0  ;;  %v561_v63 = vperm.slane %v2212_v28, 0  ;;  %v562_v19 = vperm.slane %v2214_v45, 0 }
  0xff   :  { %v563_v16 = vperm.slane %v2216_v27, 0  ;;  %v598_v30 = vperm.slane %v2210_v3, 1  ;;  %v599_v14 = vperm.slane %v2212_v28, 1  ;;  %v600_v58 = vperm.slane %v2214_v45, 1 }
 0x100   :  { %v601_v23 = vperm.slane %v2216_v27, 1  ;;  %v568_v51 = vmul.f32 %v560_v2, %v2772_v62  ;;  %v569_v41 = vmul.f32 %v561_v63, %v2772_v62  ;;  %v570_v53 = vmul.f32 %v562_v19, %v2772_v62 }
 0x101   :  { %v571_v33 = vmul.f32 %v563_v16, %v2772_v62  ;;  %v606_v42 = vmul.f32 %v598_v30, %v596_v25  ;;  %v607_v21 = vmul.f32 %v599_v14, %v596_v25  ;;  %v608_v13 = vmul.f32 %v600_v58, %v596_v25 }
 0x102   :  { %v609_v31 = vmul.f32 %v601_v23, %v596_v25  ;;  %v586_v12 = vadd.f32 %v2171_v32, %v568_v51  ;;  %v587_v56 = vadd.f32 %v2171_v32, %v569_v41  ;;  %v588_v1 = vadd.f32 %v2171_v32, %v570_v53 }
 0x103   :  { %v589_v0 = vadd.f32 %v2171_v32, %v571_v33  ;;  %v2244_v11 = vadd.f32 %v530_v5, %v510_v18  ;;  %v2246_v52 = vadd.f32 %v531_v6, %v511_v43  ;;  %v2248_v59 = vadd.f32 %v532_v17, %v512_v20  ;;  %1380 = vset.pattern.permute.xlu1 %v2771_v37  ;;  %v575_v32 = vpop.permute.xlu1 %574  ;;  %v27_v6 = vld [vmem:[%s2621_s2 + $0x30] sm:$0xff] }
 0x104   :  { %v2250_v49 = vadd.f32 %v533_v9, %v513_v24  ;;  %v2253_v60 = vadd.f32 %v606_v42, %v586_v12  ;;  %v2255_v25 = vadd.f32 %v607_v21, %v587_v56  ;;  %v2257_v61 = vadd.f32 %v608_v13, %v588_v1  ;;  %1381 = vset.pattern.permute.xlu2 %v2771_v37  ;;  %v676_v50 = vpop.permute.xlu2 %675 }
 0x105   :  { %v2259_v35 = vadd.f32 %v609_v31, %v589_v0  ;;  %983 = vperm.xlu1 %1380, %v1400_v47   ;;  %987 = vperm.xlu2 %1381, %v1401_v55   ;;  %v654_v39 = vperm.slane %v2210_v3, 3  ;;  %v2693_v18 = vperm.slane %v2212_v28, 3  ;;  %v2692_v43 = vperm.slane %v2214_v45, 3 }
 0x106   :  { %v2691_v20 = vperm.slane %v2216_v27, 3  ;;  %v564_v54 = vmul.f32 %v560_v2, %v2119_v29  ;;  %v565_v8 = vmul.f32 %v561_v63, %v2119_v29  ;;  %v566_v5 = vmul.f32 %v562_v19, %v2119_v29 }
 0x107   :  { %v2274_v24 = vmul.f32 %v654_v39, %v648_v26  ;;  %v2278_v22 = vmul.f32 %v2693_v18, %v648_v26  ;;  %v2282_v38 = vmul.f32 %v2692_v43, %v648_v26  ;;  %v567_v40 = vmul.f32 %v563_v16, %v2119_v29 }
 0x108   :  { %v2286_v15 = vmul.f32 %v2691_v20, %v648_v26  ;;  %v582_v34 = vadd.f32 %v575_v32, %v564_v54  ;;  %v583_v17 = vadd.f32 %v575_v32, %v565_v8  ;;  %v584_v36 = vadd.f32 %v575_v32, %v566_v5 }
 0x109   :  { %v585_v9 = vadd.f32 %v575_v32, %v567_v40  ;;  %v2773_v62 = vmov 0   ;;  %v2690_v2 = vperm.slane %v2210_v3, 4  ;;  %v2689_v63 = vperm.slane %v2212_v28, 4 }
 0x10a   :  { %v2688_v29 = vperm.slane %v2214_v45, 4  ;;  %v2687_v19 = vperm.slane %v2216_v27, 4  ;;  %v2683_v0 = vperm.slane %v2216_v27, 5  ;;  %v626_v32 = vperm.slane %v2210_v3, 2 }
 0x10b   :  { %v592_v26 = vpop.permute.xlu1 %591  ;;  %v686_v33 = vmul.f32 %v2690_v2, %v676_v50  ;;  %v687_v42 = vmul.f32 %v2689_v63, %v676_v50  ;;  %v627_v47 = vperm.slane %v2212_v28, 2  ;;  %v628_v55 = vperm.slane %v2214_v45, 2 }
 0x10c   :  { %v602_v16 = vmul.f32 %v598_v30, %v592_v26  ;;  %v603_v51 = vmul.f32 %v599_v14, %v592_v26  ;;  %v604_v41 = vmul.f32 %v600_v58, %v592_v26  ;;  %v605_v53 = vmul.f32 %v601_v23, %v592_v26  ;;  %v708_v30 = vpop.permute.xlu2 %707 }
 0x10d   :  { %1382 = vset.pattern.permute.xlu1 %v2773_v62  ;;  %1383 = vset.pattern.permute.xlu2 %v2773_v62  ;;  %v688_v21 = vmul.f32 %v2688_v29, %v676_v50  ;;  %v689_v13 = vmul.f32 %v2687_v19, %v676_v50  ;;  %v2686_v14 = vperm.slane %v2210_v3, 5  ;;  %v2685_v58 = vperm.slane %v2212_v28, 5 }
 0x10e   :  { %1020 = vperm.xlu1 %1382, %v2104_v10   ;;  %1033 = vperm.xlu2 %1383, %v27_v6   ;;  %v610_v31 = vadd.f32 %v602_v16, %v582_v34  ;;  %v611_v12 = vadd.f32 %v603_v51, %v583_v17  ;;  %v612_v56 = vadd.f32 %v604_v41, %v584_v36  ;;  %v2684_v23 = vperm.slane %v2214_v45, 5  ;;  %v2775_v34 = vld [vmem:[#allocation4_spill] sm:$0xff] }
 0x10f   :  { %v613_v1 = vadd.f32 %v605_v53, %v585_v9  ;;  %v629_v50 = vperm.slane %v2216_v27, 2  ;;  %v2320_v54 = vmul.f32 %v2686_v14, %v708_v30  ;;  %v2324_v8 = vmul.f32 %v2685_v58, %v708_v30 }
 0x110   :  { %v2328_v5 = vmul.f32 %v2684_v23, %v708_v30  ;;  %v2332_v40 = vmul.f32 %v2683_v0, %v708_v30  ;;  %v2774_v6 = vmov 2   ;;  %v630_v17 = vmul.f32 %v626_v32, %v2775_v34 }
 0x111   :  { %v631_v36 = vmul.f32 %v627_v47, %v2775_v34  ;;  %v632_v9 = vmul.f32 %v628_v55, %v2775_v34  ;;  %v633_v62 = vmul.f32 %v629_v50, %v2775_v34  ;;  %v2776_v26 = vmov 3  }
 0x112   :  { %v738_v51 = vperm.slane %v2210_v3, 6  ;;  %v739_v41 = vperm.slane %v2212_v28, 6  ;;  %v740_v53 = vperm.slane %v2214_v45, 6  ;;  %v741_v30 = vperm.slane %v2216_v27, 6 }
 0x113   :  { %v624_v16 = vpop.permute.xlu1 %623  ;;  %v638_v34 = vadd.f32 %v630_v17, %v610_v31  ;;  %v639_v14 = vadd.f32 %v631_v36, %v611_v12  ;;  %v641_v19 = vadd.f32 %v633_v62, %v613_v1  ;;  %v2785_v17 = vperm.slane %v2216_v27, 4 }
 0x114   :  { %v635_v0 = vmul.f32 %v627_v47, %v624_v16  ;;  %v636_v23 = vmul.f32 %v628_v55, %v624_v16  ;;  %v637_v58 = vmul.f32 %v629_v50, %v624_v16  ;;  %v736_v43 = vpop.permute.xlu2 %735  ;;  %v2778_v47 = vmov 5  }
 0x115   :  { %v746_v18 = vmul.f32 %v738_v51, %v736_v43  ;;  %v748_v31 = vmul.f32 %v740_v53, %v736_v43  ;;  %v749_v12 = vmul.f32 %v741_v30, %v736_v43  ;;  %v693_v36 = vmul.f32 %v2785_v17, %v2025_v44 }
 0x116   :  { %1385 = vset.pattern.permute.xlu1 %v2774_v6  ;;  %1386 = vset.pattern.permute.xlu2 %v2776_v26  ;;  %v634_v6 = vmul.f32 %v626_v32, %v624_v16  ;;  %v640_v26 = vadd.f32 %v632_v9, %v612_v56  ;;  %v643_v63 = vadd.f32 %v635_v0, %v2255_v25  ;;  %v2777_v56 = vmov 4  }
 0x117   :  { %1057 = vperm.xlu1 %1385, %v2104_v10   ;;  %1073 = vperm.xlu2 %1386, %v2104_v10   ;;  %v644_v2 = vadd.f32 %v636_v23, %v2257_v61  ;;  %v645_v20 = vadd.f32 %v637_v58, %v2259_v35  ;;  %v747_v32 = vmul.f32 %v739_v41, %v736_v43 }
 0x118   :  { %v642_v29 = vadd.f32 %v634_v6, %v2253_v60  ;;  %v666_v60 = vadd.f32 %v2274_v24, %v638_v34  ;;  %v667_v25 = vadd.f32 %v2278_v22, %v639_v14  ;;  %v668_v61 = vadd.f32 %v2282_v38, %v640_v26 }
 0x119   :  { %v669_v35 = vadd.f32 %v2286_v15, %v641_v19  ;;  %v2779_v24 = vperm.slane %v2212_v28, 3  ;;  %v2780_v38 = vperm.slane %v2214_v45, 3  ;;  %v2781_v19 = vperm.slane %v2216_v27, 3 }
 0x11a   :  { %v694_v1 = vadd.f32 %v686_v33, %v666_v60  ;;  %v695_v58 = vadd.f32 %v687_v42, %v667_v25  ;;  %v696_v23 = vadd.f32 %v688_v21, %v668_v61  ;;  %v2782_v42 = vperm.slane %v2210_v3, 4 }
 0x11b   :  { %v697_v0 = vadd.f32 %v689_v13, %v669_v35  ;;  %v652_v55 = vpop.permute.xlu1 %651  ;;  %v2783_v13 = vperm.slane %v2212_v28, 4 }
 0x11c   :  { %v662_v43 = vmul.f32 %v654_v39, %v652_v55  ;;  %v663_v22 = vmul.f32 %v2779_v24, %v652_v55  ;;  %v664_v15 = vmul.f32 %v2780_v38, %v652_v55  ;;  %v665_v33 = vmul.f32 %v2781_v19, %v652_v55 }
 0x11d   :  { %v690_v21 = vmul.f32 %v2782_v42, %v2025_v44  ;;  %v691_v14 = vmul.f32 %v2783_v13, %v2025_v44  ;;  %v2784_v39 = vperm.slane %v2214_v45, 4  ;;  %v2786_v55 = vmov 7  }
 0x11e   :  { %v670_v9 = vadd.f32 %v662_v43, %v642_v29  ;;  %v671_v62 = vadd.f32 %v663_v22, %v643_v63  ;;  %v672_v16 = vadd.f32 %v664_v15, %v644_v2  ;;  %v673_v6 = vadd.f32 %v665_v33, %v645_v20 }
 0x11f   :  { %1387 = vset.pattern.permute.xlu1 %v2777_v56  ;;  %1388 = vset.pattern.permute.xlu2 %v2778_v47  ;;  %v692_v50 = vmul.f32 %v2784_v39, %v2025_v44  ;;  %v2787_v24 = vmov 8   ;;  %v2788_v29 = vperm.slane %v2210_v3, 5  ;;  %v2791_v22 = vperm.slane %v2216_v27, 5 }
 0x120   :  { %1089 = vperm.xlu1 %1387, %v2104_v10   ;;  %1105 = vperm.xlu2 %1388, %v2104_v10   ;;  %v698_v34 = vadd.f32 %v690_v21, %v670_v9  ;;  %v699_v26 = vadd.f32 %v691_v14, %v671_v62  ;;  %v701_v25 = vadd.f32 %v693_v36, %v673_v6  ;;  %v2411_v42 = vmax.f32 %v2244_v11, 0.0 }
 0x121   :  { %v700_v60 = vadd.f32 %v692_v50, %v672_v16  ;;  %v2414_v21 = vmax.f32 %v2246_v52, 0.0  ;;  %v2417_v13 = vmax.f32 %v2248_v59, 0.0  ;;  %v2420_v14 = vmax.f32 %v2250_v49, 0.0 }
 0x122   :  { %v726_v61 = vadd.f32 %v2320_v54, %v698_v34  ;;  %v727_v35 = vadd.f32 %v2324_v8, %v699_v26  ;;  %v729_v47 = vadd.f32 %v2332_v40, %v701_v25  ;;  %v2789_v8 = vperm.slane %v2212_v28, 5 }
 0x123   :  { %v728_v56 = vadd.f32 %v2328_v5, %v700_v60  ;;  %v704_v44 = vpop.permute.xlu1 %703  ;;  %v2790_v40 = vperm.slane %v2214_v45, 5  ;;  %v766_v39 = vperm.slane %v2210_v3, 7  ;;  %v794_v11 = vperm.slane %v2411_v42, 0 }
 0x124   :  { %v2393_v20 = vadd.f32 %v746_v18, %v726_v61  ;;  %v2395_v2 = vadd.f32 %v747_v32, %v727_v35  ;;  %v714_v54 = vmul.f32 %v2788_v29, %v704_v44  ;;  %v715_v5 = vmul.f32 %v2789_v8, %v704_v44  ;;  %v788_v18 = vpop.permute.xlu2 %787 }
 0x125   :  { %v2397_v63 = vadd.f32 %v748_v31, %v728_v56  ;;  %v716_v43 = vmul.f32 %v2790_v40, %v704_v44  ;;  %v717_v38 = vmul.f32 %v2791_v22, %v704_v44  ;;  %v2408_v15 = vadd.f32 %v749_v12, %v729_v47 }
 0x126   :  { %v722_v32 = vadd.f32 %v714_v54, %v694_v1  ;;  %v723_v31 = vadd.f32 %v715_v5, %v695_v58  ;;  %v767_v12 = vperm.slane %v2212_v28, 7  ;;  %v768_v1 = vperm.slane %v2214_v45, 7 }
 0x127   :  { %v724_v19 = vadd.f32 %v716_v43, %v696_v23  ;;  %v725_v33 = vadd.f32 %v717_v38, %v697_v0  ;;  %v769_v58 = vperm.slane %v2216_v27, 7  ;;  %v795_v23 = vperm.slane %v2414_v21, 0 }
 0x128   :  { %1390 = vset.pattern.permute.xlu1 %v2786_v55  ;;  %1391 = vset.pattern.permute.xlu2 %v2787_v24  ;;  %v796_v52 = vperm.slane %v2417_v13, 0  ;;  %v2792_v0 = vmov 9   ;;  %v797_v59 = vperm.slane %v2420_v14, 0  ;;  %v822_v49 = vperm.slane %v2411_v42, 1 }
 0x129   :  { %1137 = vperm.xlu1 %1390, %v2104_v10   ;;  %1153 = vperm.xlu2 %1391, %v2104_v10   ;;  %v823_v50 = vperm.slane %v2414_v21, 1  ;;  %v824_v17 = vperm.slane %v2417_v13, 1  ;;  %v770_v6 = vmul.f32 %v766_v39, %v2071_v46  ;;  %v771_v34 = vmul.f32 %v767_v12, %v2071_v46 }
 0x12a   :  { %v772_v26 = vmul.f32 %v768_v1, %v2071_v46  ;;  %v773_v60 = vmul.f32 %v769_v58, %v2071_v46  ;;  %v798_v45 = vmul.f32 %v794_v11, %v788_v18  ;;  %v799_v27 = vmul.f32 %v795_v23, %v788_v18 }
 0x12b   :  { %v732_v36 = vpop.permute.xlu1 %731  ;;  %v825_v47 = vperm.slane %v2420_v14, 1 }
 0x12c   :  { %v742_v9 = vmul.f32 %v738_v51, %v732_v36  ;;  %v743_v62 = vmul.f32 %v739_v41, %v732_v36  ;;  %v745_v16 = vmul.f32 %v741_v30, %v732_v36  ;;  %v816_v25 = vpop.permute.xlu2 %815  ;;  %v800_v41 = vmul.f32 %v796_v52, %v788_v18 }
 0x12d   :  { %v826_v55 = vmul.f32 %v822_v49, %v816_v25  ;;  %v827_v24 = vmul.f32 %v823_v50, %v816_v25  ;;  %v828_v44 = vmul.f32 %v824_v17, %v816_v25  ;;  %v829_v40 = vmul.f32 %v825_v47, %v816_v25 }
 0x12e   :  { %v750_v3 = vadd.f32 %v742_v9, %v722_v32  ;;  %v751_v51 = vadd.f32 %v743_v62, %v723_v31  ;;  %v753_v28 = vadd.f32 %v745_v16, %v725_v33  ;;  %v879_v16 = vperm.slane %v2414_v21, 3 }
 0x130   :  { %v778_v30 = vadd.f32 %v770_v6, %v750_v3  ;;  %v779_v35 = vadd.f32 %v771_v34, %v751_v51  ;;  %v781_v56 = vadd.f32 %v773_v60, %v753_v28  ;;  %v880_v6 = vperm.slane %v2417_v13, 3 }
 0x131   :  { %1392 = vset.pattern.permute.xlu1 %v2792_v0  ;;  %1393 = vset.pattern.permute.xlu2 %v2739_v7  ;;  %v744_v7 = vmul.f32 %v740_v53, %v732_v36  ;;  %v801_v53 = vmul.f32 %v797_v59, %v788_v18  ;;  %v881_v34 = vperm.slane %v2420_v14, 3 }
 0x132   :  { %1169 = vperm.xlu1 %1392, %v2104_v10   ;;  %1185 = vperm.xlu2 %1393, %v2104_v10   ;;  %v806_v29 = vadd.f32 %v798_v45, %v778_v30  ;;  %v807_v54 = vadd.f32 %v799_v27, %v779_v35 }
 0x133   :  { %v752_v61 = vadd.f32 %v744_v7, %v724_v19  ;;  %v809_v5 = vadd.f32 %v801_v53, %v781_v56  ;;  %v764_v18 = vpop.permute.xlu1 %763  ;;  %v820_v7 = vpop.permute.xlu0 %819 }
 0x134   :  { %v2461_v43 = vadd.f32 %v826_v55, %v806_v29  ;;  %v2463_v22 = vadd.f32 %v827_v24, %v807_v54  ;;  %v774_v31 = vmul.f32 %v766_v39, %v764_v18  ;;  %v775_v19 = vmul.f32 %v767_v12, %v764_v18 }
 0x135   :  { %v780_v46 = vadd.f32 %v772_v26, %v752_v61  ;;  %v2468_v32 = vadd.f32 %v829_v40, %v809_v5  ;;  %v776_v33 = vmul.f32 %v768_v1, %v764_v18  ;;  %v777_v0 = vmul.f32 %v769_v58, %v764_v18 }
 0x136   :  { %v783_v36 = vadd.f32 %v775_v19, %v2395_v2  ;;  %v830_v39 = vmul.f32 %v822_v49, %v820_v7  ;;  %v831_v12 = vmul.f32 %v823_v50, %v820_v7  ;;  %v832_v1 = vmul.f32 %v824_v17, %v820_v7 }
 0x137   :  { %v808_v8 = vadd.f32 %v800_v41, %v780_v46  ;;  %v784_v9 = vadd.f32 %v776_v33, %v2397_v63  ;;  %v785_v62 = vadd.f32 %v777_v0, %v2408_v15  ;;  %v850_v58 = vperm.slane %v2411_v42, 2 }
 0x138   :  { %v851_v2 = vperm.slane %v2414_v21, 2  ;;  %v852_v63 = vperm.slane %v2417_v13, 2  ;;  %v853_v15 = vperm.slane %v2420_v14, 2  ;;  %v878_v17 = vperm.slane %v2411_v42, 3 }
 0x139   :  { %v2465_v38 = vadd.f32 %v828_v44, %v808_v8 }
 0x13a   :  { %1395 = vset.pattern.permute.xlu1 %v2756_v4  ;;  %1396 = vset.pattern.permute.xlu2 %v2758_v48  ;;  %v848_v4 = vpop.permute.xlu2 %847  ;;  %v782_v48 = vadd.f32 %v774_v31, %v2393_v20  ;;  %v833_v20 = vmul.f32 %v825_v47, %v820_v7  ;;  %v909_v7 = vperm.slane %v2420_v14, 4 }
 0x13b   :  { %1217 = vperm.xlu1 %1395, %v2104_v10   ;;  %1233 = vperm.xlu2 %1396, %v2104_v10   ;;  %v859_v51 = vmul.f32 %v851_v2, %v848_v4  ;;  %v860_v61 = vmul.f32 %v852_v63, %v848_v4 }
 0x142   :  { %v876_v26 = vpop.permute.xlu2 %875 }
 0x143   :  { %1397 = vset.pattern.permute.xlu1 %v2766_v57  ;;  %1398 = vset.pattern.permute.xlu2 %v2771_v37  ;;  %v792_v57 = vpop.permute.xlu1 %791  ;;  %v886_v41 = vmul.f32 %v878_v17, %v876_v26  ;;  %v887_v53 = vmul.f32 %v879_v16, %v876_v26  ;;  %v888_v30 = vmul.f32 %v880_v6, %v876_v26 }
 0x144   :  { %1249 = vperm.xlu1 %1397, %v2104_v10   ;;  %1265 = vperm.xlu2 %1398, %v2104_v10   ;;  %v802_v37 = vmul.f32 %v794_v11, %v792_v57  ;;  %v803_v49 = vmul.f32 %v795_v23, %v792_v57  ;;  %v804_v50 = vmul.f32 %v796_v52, %v792_v57 }
 0x145   :  { %v805_v10 = vmul.f32 %v797_v59, %v792_v57  ;;  %v858_v23 = vmul.f32 %v850_v58, %v848_v4  ;;  %v861_v52 = vmul.f32 %v853_v15, %v848_v4  ;;  %v889_v35 = vmul.f32 %v881_v34, %v876_v26 }
 0x146   :  { %v810_v60 = vadd.f32 %v802_v37, %v782_v48  ;;  %v811_v11 = vadd.f32 %v803_v49, %v783_v36  ;;  %v812_v25 = vadd.f32 %v804_v50, %v784_v9  ;;  %v906_v36 = vperm.slane %v2411_v42, 4 }
 0x147   :  { %v813_v3 = vadd.f32 %v805_v10, %v785_v62  ;;  %v907_v9 = vperm.slane %v2414_v21, 4  ;;  %v908_v62 = vperm.slane %v2417_v13, 4  ;;  %v934_v49 = vperm.slane %v2411_v42, 5 }
 0x148   :  { %v838_v28 = vadd.f32 %v830_v39, %v810_v60  ;;  %v839_v45 = vadd.f32 %v831_v12, %v811_v11  ;;  %v840_v59 = vadd.f32 %v832_v1, %v812_v25  ;;  %v900_v39 = vpop.permute.xlu0 %899  ;;  %v935_v50 = vperm.slane %v2414_v21, 5 }
 0x149   :  { %v841_v27 = vadd.f32 %v833_v20, %v813_v3  ;;  %v910_v12 = vmul.f32 %v906_v36, %v900_v39  ;;  %v911_v1 = vmul.f32 %v907_v9, %v900_v39  ;;  %v913_v20 = vmul.f32 %v909_v7, %v900_v39 }
 0x14a   :  { %v866_v46 = vadd.f32 %v858_v23, %v838_v28  ;;  %v867_v56 = vadd.f32 %v859_v51, %v839_v45  ;;  %v868_v47 = vadd.f32 %v860_v61, %v840_v59  ;;  %v936_v10 = vperm.slane %v2417_v13, 5 }
 0x14b   :  { %v869_v55 = vadd.f32 %v861_v52, %v841_v27  ;;  %v937_v26 = vperm.slane %v2420_v14, 5 }
 0x14c   :  { %v2494_v24 = vadd.f32 %v886_v41, %v866_v46  ;;  %v2496_v44 = vadd.f32 %v887_v53, %v867_v56  ;;  %v2498_v29 = vadd.f32 %v888_v30, %v868_v47 }
 0x14d   :  { %v2500_v54 = vadd.f32 %v889_v35, %v869_v55  ;;  %v844_v8 = vpop.permute.xlu1 %843  ;;  %v928_v19 = vpop.permute.xlu2 %927 }
 0x14e   :  { %v854_v5 = vmul.f32 %v850_v58, %v844_v8  ;;  %v855_v40 = vmul.f32 %v851_v2, %v844_v8  ;;  %v856_v18 = vmul.f32 %v852_v63, %v844_v8  ;;  %v857_v31 = vmul.f32 %v853_v15, %v844_v8 }
 0x14f   :  { %v912_v58 = vmul.f32 %v908_v62, %v900_v39  ;;  %v938_v51 = vmul.f32 %v934_v49, %v928_v19  ;;  %v939_v61 = vmul.f32 %v935_v50, %v928_v19  ;;  %v940_v52 = vmul.f32 %v936_v10, %v928_v19 }
 0x150   :  { %v862_v33 = vadd.f32 %v854_v5, %v2461_v43  ;;  %v863_v0 = vadd.f32 %v855_v40, %v2463_v22  ;;  %v864_v4 = vadd.f32 %v856_v18, %v2465_v38  ;;  %v865_v48 = vadd.f32 %v857_v31, %v2468_v32  ;;  %v960_v39 = vpop.permute.xlu0 %959 }
 0x151   :  { %v962_v43 = vperm.slane %v2411_v42, 6  ;;  %v963_v22 = vperm.slane %v2414_v21, 6  ;;  %v964_v38 = vperm.slane %v2417_v13, 6  ;;  %v965_v32 = vperm.slane %v2420_v14, 6 }
 0x156   :  { %v956_v60 = vpop.permute.xlu2 %955 }
 0x157   :  { %v872_v2 = vpop.permute.xlu1 %871  ;;  %v966_v45 = vmul.f32 %v962_v43, %v956_v60  ;;  %v967_v59 = vmul.f32 %v963_v22, %v956_v60  ;;  %v968_v27 = vmul.f32 %v964_v38, %v956_v60  ;;  %v969_v41 = vmul.f32 %v965_v32, %v956_v60 }
 0x158   :  { %v882_v63 = vmul.f32 %v878_v17, %v872_v2  ;;  %v883_v15 = vmul.f32 %v879_v16, %v872_v2  ;;  %v884_v57 = vmul.f32 %v880_v6, %v872_v2  ;;  %v885_v37 = vmul.f32 %v881_v34, %v872_v2 }
 0x159   :  { %v941_v17 = vmul.f32 %v937_v26, %v928_v19 }
 0x15a   :  { %v890_v11 = vadd.f32 %v882_v63, %v862_v33  ;;  %v891_v25 = vadd.f32 %v883_v15, %v863_v0  ;;  %v892_v3 = vadd.f32 %v884_v57, %v864_v4  ;;  %v893_v23 = vadd.f32 %v885_v37, %v865_v48 }
 0x15c   :  { %v918_v16 = vadd.f32 %v910_v12, %v890_v11  ;;  %v919_v6 = vadd.f32 %v911_v1, %v891_v25  ;;  %v920_v34 = vadd.f32 %v912_v58, %v892_v3  ;;  %v921_v28 = vadd.f32 %v913_v20, %v893_v23 }
 0x15d   :  { %v970_v12 = vmul.f32 %v962_v43, %v960_v39  ;;  %v971_v1 = vmul.f32 %v963_v22, %v960_v39  ;;  %v972_v58 = vmul.f32 %v964_v38, %v960_v39  ;;  %v973_v20 = vmul.f32 %v965_v32, %v960_v39 }
 0x15e   :  { %v946_v53 = vadd.f32 %v938_v51, %v918_v16  ;;  %v947_v30 = vadd.f32 %v939_v61, %v919_v6  ;;  %v948_v35 = vadd.f32 %v940_v52, %v920_v34  ;;  %v949_v46 = vadd.f32 %v941_v17, %v921_v28 }
 0x15f   :  { %v988_v63 = vpop.permute.xlu2 %987 }
 0x160   :  { %v974_v56 = vadd.f32 %v966_v45, %v946_v53  ;;  %v975_v47 = vadd.f32 %v967_v59, %v947_v30  ;;  %v976_v55 = vadd.f32 %v968_v27, %v948_v35  ;;  %v977_v8 = vadd.f32 %v969_v41, %v949_v46 }
 0x164   :  { %v904_v5 = vpop.permute.xlu1 %903 }
 0x165   :  { %v914_v40 = vmul.f32 %v906_v36, %v904_v5  ;;  %v915_v18 = vmul.f32 %v907_v9, %v904_v5  ;;  %v916_v31 = vmul.f32 %v908_v62, %v904_v5  ;;  %v917_v19 = vmul.f32 %v909_v7, %v904_v5 }
 0x166   :  { %v990_v7 = vperm.slane %v2411_v42, 7 }
 0x167   :  { %v922_v33 = vadd.f32 %v914_v40, %v2494_v24  ;;  %v923_v0 = vadd.f32 %v915_v18, %v2496_v44  ;;  %v924_v4 = vadd.f32 %v916_v31, %v2498_v29  ;;  %v925_v48 = vadd.f32 %v917_v19, %v2500_v54 }
 0x168   :  { %v991_v24 = vperm.slane %v2414_v21, 7  ;;  %v992_v44 = vperm.slane %v2417_v13, 7  ;;  %v993_v29 = vperm.slane %v2420_v14, 7  ;;  %v998_v38 = vmul.f32 %v990_v7, %v988_v63  ;;  %v1034_v61 = vpop.permute.xlu2 %1033 }
 0x16a   :  { %v999_v32 = vmul.f32 %v991_v24, %v988_v63  ;;  %v1000_v37 = vmul.f32 %v992_v44, %v988_v63  ;;  %v1001_v60 = vmul.f32 %v993_v29, %v988_v63 }
 0x16d   :  { %v932_v2 = vpop.permute.xlu1 %931 }
 0x16e   :  { %v942_v15 = vmul.f32 %v934_v49, %v932_v2  ;;  %v943_v36 = vmul.f32 %v935_v50, %v932_v2  ;;  %v944_v9 = vmul.f32 %v936_v10, %v932_v2  ;;  %v945_v62 = vmul.f32 %v937_v26, %v932_v2 }
 0x170   :  { %v950_v54 = vadd.f32 %v942_v15, %v922_v33  ;;  %v951_v57 = vadd.f32 %v943_v36, %v923_v0  ;;  %v952_v43 = vadd.f32 %v944_v9, %v924_v4  ;;  %v953_v22 = vadd.f32 %v945_v62, %v925_v48 }
 0x171   :  { %v1074_v46 = vpop.permute.xlu2 %1073 }
 0x172   :  { %v978_v49 = vadd.f32 %v970_v12, %v950_v54  ;;  %v979_v50 = vadd.f32 %v971_v1, %v951_v57  ;;  %v980_v10 = vadd.f32 %v972_v58, %v952_v43  ;;  %v981_v26 = vadd.f32 %v973_v20, %v953_v22  ;;  %v1042_v58 = vpop.permute.xlu0 %1041 }
 0x174   :  { %v2526_v11 = vadd.f32 %v998_v38, %v978_v49  ;;  %v2528_v42 = vadd.f32 %v999_v32, %v979_v50  ;;  %v2530_v21 = vadd.f32 %v1000_v37, %v980_v10  ;;  %v2532_v13 = vadd.f32 %v1001_v60, %v981_v26 }
 0x177   :  { %v984_v14 = vpop.permute.xlu1 %983 }
 0x178   :  { %v994_v25 = vmul.f32 %v990_v7, %v984_v14  ;;  %v995_v3 = vmul.f32 %v991_v24, %v984_v14  ;;  %v996_v23 = vmul.f32 %v992_v44, %v984_v14  ;;  %v997_v51 = vmul.f32 %v993_v29, %v984_v14 }
 0x17a   :  { %v1002_v52 = vadd.f32 %v994_v25, %v974_v56  ;;  %v1003_v17 = vadd.f32 %v995_v3, %v975_v47  ;;  %v1004_v16 = vadd.f32 %v996_v23, %v976_v55  ;;  %v1005_v6 = vadd.f32 %v997_v51, %v977_v8  ;;  %v1106_v10 = vpop.permute.xlu2 %1105 }
 0x17c   :  { %v2534_v34 = vmax.f32 %v1002_v52, 0.0  ;;  %v2536_v28 = vmax.f32 %v1003_v17, 0.0  ;;  %v2538_v45 = vmax.f32 %v1004_v16, 0.0  ;;  %v2540_v59 = vmax.f32 %v1005_v6, 0.0 }
 0x17e   :  { %v1023_v27 = vperm.slane %v2534_v34, 0  ;;  %v1024_v41 = vperm.slane %v2536_v28, 0  ;;  %v1025_v53 = vperm.slane %v2538_v45, 0  ;;  %v1026_v30 = vperm.slane %v2540_v59, 0 }
 0x17f   :  { %v1044_v5 = vperm.slane %v2534_v34, 1  ;;  %v1045_v40 = vperm.slane %v2536_v28, 1  ;;  %v1046_v18 = vperm.slane %v2538_v45, 1  ;;  %v1047_v31 = vperm.slane %v2540_v59, 1 }
 0x180   :  { %v1021_v35 = vpop.permute.xlu1 %1020  ;;  %v1108_v19 = vperm.slane %v2534_v34, 5  ;;  %v1109_v33 = vperm.slane %v2536_v28, 5  ;;  %v1110_v0 = vperm.slane %v2538_v45, 5  ;;  %v1111_v4 = vperm.slane %v2540_v59, 5 }
 0x181   :  { %v1027_v56 = vmul.f32 %v1023_v27, %v1021_v35  ;;  %v1028_v47 = vmul.f32 %v1024_v41, %v1021_v35  ;;  %v1029_v55 = vmul.f32 %v1025_v53, %v1021_v35  ;;  %v1030_v8 = vmul.f32 %v1026_v30, %v1021_v35 }
 0x182   :  { %v1060_v20 = vperm.slane %v2534_v34, 2  ;;  %v1061_v2 = vperm.slane %v2536_v28, 2  ;;  %v1062_v63 = vperm.slane %v2538_v45, 2  ;;  %v1063_v15 = vperm.slane %v2540_v59, 2 }
 0x183   :  { %v1036_v48 = vadd.f32 %v1034_v61, %v1027_v56  ;;  %v1037_v39 = vadd.f32 %v1034_v61, %v1028_v47  ;;  %v1038_v12 = vadd.f32 %v1034_v61, %v1029_v55  ;;  %v1039_v1 = vadd.f32 %v1034_v61, %v1030_v8 }
 0x184   :  { %v1048_v9 = vmul.f32 %v1044_v5, %v1042_v58  ;;  %v1049_v62 = vmul.f32 %v1045_v40, %v1042_v58  ;;  %v1050_v7 = vmul.f32 %v1046_v18, %v1042_v58  ;;  %v1051_v24 = vmul.f32 %v1047_v31, %v1042_v58  ;;  %v1154_v58 = vpop.permute.xlu2 %1153 }
 0x185   :  { %v1076_v37 = vperm.slane %v2534_v34, 3  ;;  %v1077_v60 = vperm.slane %v2536_v28, 3  ;;  %v1078_v49 = vperm.slane %v2538_v45, 3  ;;  %v1079_v50 = vperm.slane %v2540_v59, 3 }
 0x186   :  { %v1052_v43 = vadd.f32 %v1048_v9, %v1036_v48  ;;  %v1053_v22 = vadd.f32 %v1049_v62, %v1037_v39  ;;  %v1054_v38 = vadd.f32 %v1050_v7, %v1038_v12  ;;  %v1055_v32 = vadd.f32 %v1051_v24, %v1039_v1  ;;  %v1122_v24 = vpop.permute.xlu0 %1121 }
 0x187   :  { %v1112_v23 = vmul.f32 %v1108_v19, %v1106_v10  ;;  %v1113_v51 = vmul.f32 %v1109_v33, %v1106_v10  ;;  %v1114_v61 = vmul.f32 %v1110_v0, %v1106_v10  ;;  %v1115_v52 = vmul.f32 %v1111_v4, %v1106_v10 }
 0x188   :  { %v1080_v17 = vmul.f32 %v1076_v37, %v1074_v46  ;;  %v1081_v16 = vmul.f32 %v1077_v60, %v1074_v46  ;;  %v1082_v6 = vmul.f32 %v1078_v49, %v1074_v46  ;;  %v1083_v27 = vmul.f32 %v1079_v50, %v1074_v46 }
 0x189   :  { %v1058_v36 = vpop.permute.xlu1 %1057  ;;  %v1092_v41 = vperm.slane %v2534_v34, 4  ;;  %v1093_v53 = vperm.slane %v2536_v28, 4  ;;  %v1094_v30 = vperm.slane %v2538_v45, 4  ;;  %v1095_v35 = vperm.slane %v2540_v59, 4 }
 0x18a   :  { %v1064_v44 = vmul.f32 %v1060_v20, %v1058_v36  ;;  %v1065_v29 = vmul.f32 %v1061_v2, %v1058_v36  ;;  %v1066_v54 = vmul.f32 %v1062_v63, %v1058_v36  ;;  %v1067_v57 = vmul.f32 %v1063_v15, %v1058_v36 }
 0x18b   :  { %v1124_v33 = vperm.slane %v2534_v34, 6  ;;  %v1125_v46 = vperm.slane %v2536_v28, 6  ;;  %v1126_v0 = vperm.slane %v2538_v45, 6  ;;  %v1127_v4 = vperm.slane %v2540_v59, 6 }
 0x18c   :  { %v1068_v26 = vadd.f32 %v1064_v44, %v1052_v43  ;;  %v1069_v14 = vadd.f32 %v1065_v29, %v1053_v22  ;;  %v1070_v25 = vadd.f32 %v1066_v54, %v1054_v38  ;;  %v1071_v3 = vadd.f32 %v1067_v57, %v1055_v32 }
 0x18d   :  { %v2571_v36 = vmax.f32 %v2526_v11, 0.0  ;;  %v2574_v9 = vmax.f32 %v2528_v42, 0.0  ;;  %v2577_v62 = vmax.f32 %v2530_v21, 0.0  ;;  %v2580_v7 = vmax.f32 %v2532_v13, 0.0 }
 0x18e   :  { %v1084_v47 = vadd.f32 %v1080_v17, %v1068_v26  ;;  %v1085_v55 = vadd.f32 %v1081_v16, %v1069_v14  ;;  %v1086_v8 = vadd.f32 %v1082_v6, %v1070_v25  ;;  %v1087_v5 = vadd.f32 %v1083_v27, %v1071_v3  ;;  %v1186_v17 = vpop.permute.xlu2 %1185 }
 0x18f   :  { %v1128_v44 = vmul.f32 %v1124_v33, %v1122_v24  ;;  %v1129_v29 = vmul.f32 %v1125_v46, %v1122_v24  ;;  %v1130_v54 = vmul.f32 %v1126_v0, %v1122_v24  ;;  %v1131_v57 = vmul.f32 %v1127_v4, %v1122_v24  ;;  %v1202_v46 = vpop.permute.xlu0 %1201 }
 0x190   :  { %v1140_v43 = vperm.slane %v2534_v34, 7  ;;  %v1141_v22 = vperm.slane %v2536_v28, 7  ;;  %v1142_v11 = vperm.slane %v2538_v45, 7  ;;  %v1143_v42 = vperm.slane %v2540_v59, 7 }
 0x191   :  { %v1156_v26 = vperm.slane %v2571_v36, 0  ;;  %v1157_v14 = vperm.slane %v2574_v9, 0  ;;  %v1158_v34 = vperm.slane %v2577_v62, 0  ;;  %v1159_v28 = vperm.slane %v2580_v7, 0 }
 0x192   :  { %v1090_v56 = vpop.permute.xlu1 %1089 }
 0x193   :  { %v1096_v40 = vmul.f32 %v1092_v41, %v1090_v56  ;;  %v1097_v18 = vmul.f32 %v1093_v53, %v1090_v56  ;;  %v1098_v31 = vmul.f32 %v1094_v30, %v1090_v56  ;;  %v1099_v19 = vmul.f32 %v1095_v35, %v1090_v56 }
 0x194   :  { %v1204_v53 = vperm.slane %v2571_v36, 3  ;;  %v1205_v30 = vperm.slane %v2574_v9, 3  ;;  %v1206_v35 = vperm.slane %v2577_v62, 3  ;;  %v1207_v56 = vperm.slane %v2580_v7, 3 }
 0x195   :  { %v1100_v48 = vadd.f32 %v1096_v40, %v1084_v47  ;;  %v1101_v39 = vadd.f32 %v1097_v18, %v1085_v55  ;;  %v1102_v12 = vadd.f32 %v1098_v31, %v1086_v8  ;;  %v1103_v1 = vadd.f32 %v1099_v19, %v1087_v5 }
 0x196   :  { %v1172_v47 = vperm.slane %v2571_v36, 1  ;;  %v1173_v55 = vperm.slane %v2574_v9, 1  ;;  %v1174_v8 = vperm.slane %v2577_v62, 1  ;;  %v1175_v5 = vperm.slane %v2580_v7, 1 }
 0x197   :  { %v1116_v20 = vadd.f32 %v1112_v23, %v1100_v48  ;;  %v1117_v2 = vadd.f32 %v1113_v51, %v1101_v39  ;;  %v1118_v63 = vadd.f32 %v1114_v61, %v1102_v12  ;;  %v1119_v15 = vadd.f32 %v1115_v52, %v1103_v1 }
 0x198   :  { %v1160_v23 = vmul.f32 %v1156_v26, %v1154_v58  ;;  %v1161_v51 = vmul.f32 %v1157_v14, %v1154_v58  ;;  %v1162_v61 = vmul.f32 %v1158_v34, %v1154_v58  ;;  %v1163_v52 = vmul.f32 %v1159_v28, %v1154_v58 }
 0x199   :  { %v1132_v32 = vadd.f32 %v1128_v44, %v1116_v20  ;;  %v1133_v21 = vadd.f32 %v1129_v29, %v1117_v2  ;;  %v1134_v37 = vadd.f32 %v1130_v54, %v1118_v63  ;;  %v1135_v60 = vadd.f32 %v1131_v57, %v1119_v15 }
 0x19a   :  { %v1188_v40 = vperm.slane %v2571_v36, 2  ;;  %v1189_v18 = vperm.slane %v2574_v9, 2  ;;  %v1190_v31 = vperm.slane %v2577_v62, 2  ;;  %v1191_v19 = vperm.slane %v2580_v7, 2 }
 0x19b   :  { %v1138_v38 = vpop.permute.xlu1 %1137  ;;  %v1208_v44 = vmul.f32 %v1204_v53, %v1202_v46  ;;  %v1209_v29 = vmul.f32 %v1205_v30, %v1202_v46  ;;  %v1210_v54 = vmul.f32 %v1206_v35, %v1202_v46  ;;  %v1211_v57 = vmul.f32 %v1207_v56, %v1202_v46 }
 0x19c   :  { %v1144_v13 = vmul.f32 %v1140_v43, %v1138_v38  ;;  %v1145_v49 = vmul.f32 %v1141_v22, %v1138_v38  ;;  %v1146_v50 = vmul.f32 %v1142_v11, %v1138_v38  ;;  %v1147_v10 = vmul.f32 %v1143_v42, %v1138_v38  ;;  %v1234_v38 = vpop.permute.xlu2 %1233 }
 0x19d   :  { %v1192_v12 = vmul.f32 %v1188_v40, %v1186_v17  ;;  %v1193_v1 = vmul.f32 %v1189_v18, %v1186_v17  ;;  %v1194_v58 = vmul.f32 %v1190_v31, %v1186_v17  ;;  %v1195_v20 = vmul.f32 %v1191_v19, %v1186_v17 }
 0x19e   :  { %v1148_v45 = vadd.f32 %v1144_v13, %v1132_v32  ;;  %v1149_v25 = vadd.f32 %v1145_v49, %v1133_v21  ;;  %v1150_v59 = vadd.f32 %v1146_v50, %v1134_v37  ;;  %v1151_v3 = vadd.f32 %v1147_v10, %v1135_v60 }
 0x19f   :  { %v1220_v13 = vperm.slane %v2571_v36, 4  ;;  %v1221_v49 = vperm.slane %v2574_v9, 4  ;;  %v1222_v50 = vperm.slane %v2577_v62, 4  ;;  %v1223_v10 = vperm.slane %v2580_v7, 4 }
 0x1a0   :  { %v1164_v16 = vadd.f32 %v1160_v23, %v1148_v45  ;;  %v1165_v6 = vadd.f32 %v1161_v51, %v1149_v25  ;;  %v1166_v27 = vadd.f32 %v1162_v61, %v1150_v59  ;;  %v1167_v41 = vadd.f32 %v1163_v52, %v1151_v3 }
 0x1a1   :  { %v1236_v26 = vperm.slane %v2571_v36, 5  ;;  %v1237_v14 = vperm.slane %v2574_v9, 5  ;;  %v1238_v34 = vperm.slane %v2577_v62, 5  ;;  %v1239_v28 = vperm.slane %v2580_v7, 5 }
 0x1a2   :  { %v1255_v40 = vperm.slane %v2580_v7, 6  ;;  %v1268_v18 = vperm.slane %v2571_v36, 7  ;;  %v1269_v31 = vperm.slane %v2574_v9, 7  ;;  %v1270_v19 = vperm.slane %v2577_v62, 7 }
 0x1a3   :  { %v1240_v51 = vmul.f32 %v1236_v26, %v1234_v38  ;;  %v1241_v61 = vmul.f32 %v1237_v14, %v1234_v38  ;;  %v1242_v52 = vmul.f32 %v1238_v34, %v1234_v38  ;;  %v1243_v17 = vmul.f32 %v1239_v28, %v1234_v38 }
 0x1a4   :  { %v1170_v33 = vpop.permute.xlu1 %1169 }
 0x1a5   :  { %v1176_v0 = vmul.f32 %v1172_v47, %v1170_v33  ;;  %v1177_v4 = vmul.f32 %v1173_v55, %v1170_v33  ;;  %v1178_v48 = vmul.f32 %v1174_v8, %v1170_v33  ;;  %v1179_v39 = vmul.f32 %v1175_v5, %v1170_v33  ;;  %v1266_v47 = vpop.permute.xlu2 %1265 }
 0x1a6   :  { %v1252_v55 = vperm.slane %v2571_v36, 6  ;;  %v1253_v8 = vperm.slane %v2574_v9, 6  ;;  %v1254_v5 = vperm.slane %v2577_v62, 6  ;;  %v1271_v33 = vperm.slane %v2580_v7, 7 }
 0x1a7   :  { %v1180_v2 = vadd.f32 %v1176_v0, %v1164_v16  ;;  %v1181_v63 = vadd.f32 %v1177_v4, %v1165_v6  ;;  %v1182_v15 = vadd.f32 %v1178_v48, %v1166_v27  ;;  %v1183_v24 = vadd.f32 %v1179_v39, %v1167_v41 }
 0x1a8   :  { %v1294_v36 = vlaneseq }
 0x1a9   :  { %v1196_v43 = vadd.f32 %v1192_v12, %v1180_v2  ;;  %v1197_v22 = vadd.f32 %v1193_v1, %v1181_v63  ;;  %v1198_v11 = vadd.f32 %v1194_v58, %v1182_v15  ;;  %v1199_v42 = vadd.f32 %v1195_v20, %v1183_v24 }
 0x1aa   :  { %v1272_v12 = vmul.f32 %v1268_v18, %v1266_v47  ;;  %v1273_v1 = vmul.f32 %v1269_v31, %v1266_v47  ;;  %v1274_v58 = vmul.f32 %v1270_v19, %v1266_v47  ;;  %v1275_v20 = vmul.f32 %v1271_v33, %v1266_v47 }
 0x1ab   :  { %v1212_v32 = vadd.f32 %v1208_v44, %v1196_v43  ;;  %v1213_v21 = vadd.f32 %v1209_v29, %v1197_v22  ;;  %v1214_v37 = vadd.f32 %v1210_v54, %v1198_v11  ;;  %v1215_v60 = vadd.f32 %v1211_v57, %v1199_v42 }
 0x1ac   :  { %vm1296_vm3 = vcmp.lt.s32.totalorder %v1294_v36, 512 }
 0x1ad   :  { %v1218_v45 = vpop.permute.xlu1 %1217 }
 0x1ae   :  { %v1224_v25 = vmul.f32 %v1220_v13, %v1218_v45  ;;  %v1225_v59 = vmul.f32 %v1221_v49, %v1218_v45  ;;  %v1226_v3 = vmul.f32 %v1222_v50, %v1218_v45  ;;  %v1227_v23 = vmul.f32 %v1223_v10, %v1218_v45 }
 0x1b0   :  { %v1228_v16 = vadd.f32 %v1224_v25, %v1212_v32  ;;  %v1229_v6 = vadd.f32 %v1225_v59, %v1213_v21  ;;  %v1230_v27 = vadd.f32 %v1226_v3, %v1214_v37  ;;  %v1231_v41 = vadd.f32 %v1227_v23, %v1215_v60 }
 0x1b2   :  { %v1244_v53 = vadd.f32 %v1240_v51, %v1228_v16  ;;  %v1245_v30 = vadd.f32 %v1241_v61, %v1229_v6  ;;  %v1246_v35 = vadd.f32 %v1242_v52, %v1230_v27  ;;  %v1247_v56 = vadd.f32 %v1243_v17, %v1231_v41 }
 0x1b6   :  { %v1250_v46 = vpop.permute.xlu1 %1249 }
 0x1b7   :  { %v1256_v0 = vmul.f32 %v1252_v55, %v1250_v46  ;;  %v1257_v4 = vmul.f32 %v1253_v8, %v1250_v46  ;;  %v1258_v48 = vmul.f32 %v1254_v5, %v1250_v46  ;;  %v1259_v39 = vmul.f32 %v1255_v40, %v1250_v46 }
 0x1b9   :  { %v1260_v2 = vadd.f32 %v1256_v0, %v1244_v53  ;;  %v1261_v63 = vadd.f32 %v1257_v4, %v1245_v30  ;;  %v1262_v15 = vadd.f32 %v1258_v48, %v1246_v35  ;;  %v1263_v24 = vadd.f32 %v1259_v39, %v1247_v56 }
 0x1bb   :  { %v1276_v44 = vadd.f32 %v1272_v12, %v1260_v2  ;;  %v1277_v9 = vadd.f32 %v1273_v1, %v1261_v63  ;;  %v1278_v29 = vadd.f32 %v1274_v58, %v1262_v15  ;;  %v1279_v62 = vadd.f32 %v1275_v20, %v1263_v24 }
 0x1bd   :  { %v1284_v7 = vrot.slane %v1277_v9, 7  ;;  %v1285_v54 = vrot.slane %v1278_v29, 6  ;;  %v1286_v57 = vrot.slane %v1279_v62, 5 }
 0x1bf   :  { %v1288_v43 = vsel %vm1287_vm0, %v1276_v44, %v1284_v7  ;;  %v1290_v22 = vsel %vm1289_vm1, %v1285_v54, %v1286_v57 }
 0x1c0   :  { %v1292_v11 = vsel %vm1291_vm2, %v1288_v43, %v1290_v22 }
 0x1c1   :  { %1298 = vst.msk [vmem:[%s2624_s3] sm:$0xf] %vm1296_vm3, %v1292_v11 }

</bundles_post_ra>
